<compile_context>
chip_gen: v7x
topology: tpu7x:2x2x1
jax: 0.10.0
libtpu: 0.0.40
codegen_flags: <defaults>
</compile_context>

<pallas_src>
import functools
import jax
import jax.numpy as jnp
from jax.experimental import pallas as pl
from jax.experimental.pallas import tpu as pltpu


# ---------------------------------------------------------------------------
# Helpers
# ---------------------------------------------------------------------------

def _tile(dim, target, align=8):
    """Largest divisor of `dim` that is <= target and a multiple of `align`.

    Falls back to the full dim (always a legal block shape) if no aligned divisor exists.
    """
    if dim <= target:
        return dim
    for t in range(min(target, dim), 0, -1):
        if dim % t == 0 and t % align == 0:
            return t
    return dim


def _default_vmem_limit():
    """Generation-aware VMEM limit: 3/4 of physical capacity (v7x only has 64 MiB)."""
    cap = None
    try:
        cap = getattr(pltpu.get_tpu_info(), "vmem_capacity_bytes", None)
    except Exception:
        cap = None
    if not cap:
        cap = 64 * 1024 * 1024   # conservative fallback = v7x physical VMEM
    return int(cap) * 3 // 4


_VMEM_LIMIT = _default_vmem_limit()


# ---------------------------------------------------------------------------
# Pallas kernels
# ---------------------------------------------------------------------------

def _linear_kernel(x_ref, w_ref, b_ref, o_ref, acc_ref):
    """Tiled matmul, bf16 operands, f32 accumulator; bias added on last k step."""
    @pl.when(pl.program_id(2) == 0)
    def _():
        acc_ref[...] = jnp.zeros_like(acc_ref)

    acc_ref[...] += jnp.dot(x_ref[...], w_ref[...],
                            preferred_element_type=jnp.float32)

    @pl.when(pl.program_id(2) == pl.num_programs(2) - 1)
    def _():
        o_ref[...] = (acc_ref[...] + b_ref[...]).astype(o_ref.dtype)


def linear(x, w, b, tm=256, tn=512, tk=512):
    """x: (M, K) bf16 @ w: (K, N) bf16 + b: (N,) f32 -> (M, N) bf16."""
    M, K = x.shape
    N = w.shape[1]
    tm = _tile(M, tm, align=8)
    tn = _tile(N, tn, align=128)
    tk = _tile(K, tk, align=128)
    return pl.pallas_call(
        _linear_kernel,
        out_shape=jax.ShapeDtypeStruct((M, N), jnp.bfloat16),
        grid=(M // tm, N // tn, K // tk),
        in_specs=[
            pl.BlockSpec((tm, tk), lambda i, j, k: (i, k)),
            pl.BlockSpec((tk, tn), lambda i, j, k: (k, j)),
            pl.BlockSpec((1, tn), lambda i, j, k: (0, j)),
        ],
        out_specs=pl.BlockSpec((tm, tn), lambda i, j, k: (i, j)),
        scratch_shapes=[pltpu.VMEM((tm, tn), jnp.float32)],
        compiler_params=pltpu.CompilerParams(
            dimension_semantics=("parallel", "parallel", "arbitrary"),
            vmem_limit_bytes=_VMEM_LIMIT),
    )(x, w, b.reshape(1, N))


def _proj_res_ln_kernel(x_ref, w_ref, b_ref, r_ref, g_ref, bt_ref, o_ref, acc_ref, *, eps):
    """out = LayerNorm(residual + x @ w + b): matmul with fused residual + LN epilogue."""
    k = pl.program_id(1)

    @pl.when(k == 0)
    def _():
        acc_ref[...] = jnp.zeros_like(acc_ref)

    acc_ref[...] += jnp.dot(x_ref[...], w_ref[...],
                            preferred_element_type=jnp.float32)

    @pl.when(k == pl.num_programs(1) - 1)
    def _():
        z = acc_ref[...] + b_ref[...] + r_ref[...].astype(jnp.float32)
        mu = jnp.mean(z, axis=-1, keepdims=True)
        var = jnp.mean((z - mu) ** 2, axis=-1, keepdims=True)
        zn = (z - mu) * jax.lax.rsqrt(var + eps)
        o_ref[...] = (zn * g_ref[...] + bt_ref[...]).astype(o_ref.dtype)


def proj_residual_ln(x, w, b, residual, gamma, beta, eps=1e-5, tm=256, tk=512):
    """x: (M, K) bf16, residual: (M, E) bf16 -> LN(residual + x@w + b) as (M, E) bf16."""
    M, K = x.shape
    E = w.shape[1]
    tm = _tile(M, tm, align=8)
    tk = _tile(K, tk, align=128)
    return pl.pallas_call(
        functools.partial(_proj_res_ln_kernel, eps=eps),
        out_shape=jax.ShapeDtypeStruct((M, E), jnp.bfloat16),
        grid=(M // tm, K // tk),
        in_specs=[
            pl.BlockSpec((tm, tk), lambda i, k: (i, k)),
            pl.BlockSpec((tk, E), lambda i, k: (k, 0)),
            pl.BlockSpec((1, E), lambda i, k: (0, 0)),
            pl.BlockSpec((tm, E), lambda i, k: (i, 0)),
            pl.BlockSpec((1, E), lambda i, k: (0, 0)),
            pl.BlockSpec((1, E), lambda i, k: (0, 0)),
        ],
        out_specs=pl.BlockSpec((tm, E), lambda i, k: (i, 0)),
        scratch_shapes=[pltpu.VMEM((tm, E), jnp.float32)],
        compiler_params=pltpu.CompilerParams(
            dimension_semantics=("parallel", "arbitrary"),
            vmem_limit_bytes=_VMEM_LIMIT),
    )(x, w, b.reshape(1, E), residual, gamma.reshape(1, E), beta.reshape(1, E))


def _ffn_res_ln_kernel(x_ref, w1_ref, b1_ref, w2_ref, b2_ref, g_ref, bt_ref,
                       o_ref, acc_ref, *, eps):
    """out = LayerNorm(x + relu(x@w1+b1)@w2 + b2), FF dimension chunked on grid axis 1."""
    f = pl.program_id(1)

    @pl.when(f == 0)
    def _():
        acc_ref[...] = jnp.zeros_like(acc_ref)

    h = jnp.dot(x_ref[...], w1_ref[...], preferred_element_type=jnp.float32) + b1_ref[...]
    h = jnp.maximum(h, 0.0).astype(jnp.bfloat16)
    acc_ref[...] += jnp.dot(h, w2_ref[...], preferred_element_type=jnp.float32)

    @pl.when(f == pl.num_programs(1) - 1)
    def _():
        z = acc_ref[...] + b2_ref[...] + x_ref[...].astype(jnp.float32)  # residual == FFN input
        mu = jnp.mean(z, axis=-1, keepdims=True)
        var = jnp.mean((z - mu) ** 2, axis=-1, keepdims=True)
        zn = (z - mu) * jax.lax.rsqrt(var + eps)
        o_ref[...] = (zn * g_ref[...] + bt_ref[...]).astype(o_ref.dtype)


def ffn_residual_ln(x, p, gamma, beta, eps=1e-5, tm=256, tf=512):
    """x: (M, E) bf16 -> LN(x + FFN(x)) as (M, E) bf16, FF chunked to bound VMEM."""
    M, E = x.shape
    FF = p["w1"].shape[1]
    tm = _tile(M, tm, align=8)
    tf = _tile(FF, tf, align=128)
    return pl.pallas_call(
        functools.partial(_ffn_res_ln_kernel, eps=eps),
        out_shape=jax.ShapeDtypeStruct((M, E), jnp.bfloat16),
        grid=(M // tm, FF // tf),
        in_specs=[
            pl.BlockSpec((tm, E), lambda i, f: (i, 0)),   # x (constant over f: not re-fetched)
            pl.BlockSpec((E, tf), lambda i, f: (0, f)),   # w1 chunk
            pl.BlockSpec((1, tf), lambda i, f: (0, f)),   # b1 chunk
            pl.BlockSpec((tf, E), lambda i, f: (f, 0)),   # w2 chunk
            pl.BlockSpec((1, E), lambda i, f: (0, 0)),    # b2
            pl.BlockSpec((1, E), lambda i, f: (0, 0)),    # gamma
            pl.BlockSpec((1, E), lambda i, f: (0, 0)),    # beta
        ],
        out_specs=pl.BlockSpec((tm, E), lambda i, f: (i, 0)),
        scratch_shapes=[pltpu.VMEM((tm, E), jnp.float32)],
        compiler_params=pltpu.CompilerParams(
            dimension_semantics=("parallel", "arbitrary"),
            vmem_limit_bytes=_VMEM_LIMIT),
    )(x, p["w1"], p["b1"].reshape(1, FF), p["w2"], p["b2"].reshape(1, E),
      gamma.reshape(1, E), beta.reshape(1, E))


def _attn_kernel(*refs, scale, causal, has_mask, kv_block_size):
    """Flash-style attention for one (batch, head); online softmax over KV blocks."""
    if has_mask:
        q_ref, k_ref, v_ref, msk_ref, o_ref, m_scr, l_scr, acc_scr = refs
    else:
        q_ref, k_ref, v_ref, o_ref, m_scr, l_scr, acc_scr = refs

    si = pl.program_id(2)

    @pl.when(si == 0)
    def _():
        m_scr[...] = jnp.full_like(m_scr, -jnp.inf)
        l_scr[...] = jnp.zeros_like(l_scr)
        acc_scr[...] = jnp.zeros_like(acc_scr)

    q = q_ref[0]                       # (T, Dh)  bf16
    k = k_ref[0]                       # (ts, Dh) bf16
    v = v_ref[0]                       # (ts, Dh) bf16
    T = q.shape[0]
    ts = k.shape[0]

    s = jax.lax.dot_general(q, k, (((1,), (1,)), ((), ())),
                            preferred_element_type=jnp.float32) * scale   # (T, ts)

    keep = None
    if causal:
        row = jax.lax.broadcasted_iota(jnp.int32, (T, ts), 0)
        col = jax.lax.broadcasted_iota(jnp.int32, (T, ts), 1) + si * kv_block_size
        keep = row >= col
    if has_mask:
        # Matches the reference DecoderLayer: mask True (=1.0) means "may attend",
        # combined with the causal mask via logical AND.
        user = msk_ref[...] > 0.5
        keep = user if keep is None else jnp.logical_and(keep, user)
    if keep is not None:
        s = jnp.where(keep, s, jnp.float32(-1e30))

    m_prev = m_scr[...]                                            # (T, 1)
    m_new = jnp.maximum(m_prev, jnp.max(s, axis=-1, keepdims=True))
    alpha = jnp.exp(m_prev - m_new)
    p = jnp.exp(s - m_new)
    l_scr[...] = alpha * l_scr[...] + jnp.sum(p, axis=-1, keepdims=True)
    acc_scr[...] = alpha * acc_scr[...] + jax.lax.dot_general(
        p.astype(jnp.bfloat16), v, (((1,), (0,)), ((), ())),
        preferred_element_type=jnp.float32)
    m_scr[...] = m_new

    @pl.when(si == pl.num_programs(2) - 1)
    def _():
        o_ref[0] = (acc_scr[...] *
                    pl.reciprocal(l_scr[...], approx=True)).astype(o_ref.dtype)


def attention(q_arr, kv_arr, *, n_batch, n_heads, q_off, k_off, v_off,
              causal, mask=None, kv_block=512):
    """Head-batched flash attention.

    q_arr : (Gq*N*H, T, Dh) bf16 — Q slabs; flat index = q_off + b*H + h.
    kv_arr: (Gk*N*H, S, Dh) bf16 — K/V slabs at k_off/v_off offsets (may alias q_arr).
    Returns (N*H, T, Dh) bf16.
    """
    T, Dh = q_arr.shape[1], q_arr.shape[2]
    S = kv_arr.shape[1]
    ts = S if S <= kv_block else _tile(S, kv_block, align=128)
    n_kv = S // ts
    scale = 1.0 / (Dh ** 0.5)
    has_mask = mask is not None

    in_specs = [
        pl.BlockSpec((1, T, Dh), lambda b, h, si: (q_off + b * n_heads + h, 0, 0)),
        pl.BlockSpec((1, ts, Dh), lambda b, h, si: (k_off + b * n_heads + h, si, 0)),
        pl.BlockSpec((1, ts, Dh), lambda b, h, si: (v_off + b * n_heads + h, si, 0)),
    ]
    args = [q_arr, kv_arr, kv_arr]
    if has_mask:
        in_specs.append(pl.BlockSpec((T, ts), lambda b, h, si: (0, si)))
        args.append(mask)

    return pl.pallas_call(
        functools.partial(_attn_kernel, scale=scale, causal=causal,
                          has_mask=has_mask, kv_block_size=ts),
        out_shape=jax.ShapeDtypeStruct((n_batch * n_heads, T, Dh), jnp.bfloat16),
        grid=(n_batch, n_heads, n_kv),
        in_specs=in_specs,
        out_specs=pl.BlockSpec((1, T, Dh), lambda b, h, si: (b * n_heads + h, 0, 0)),
        scratch_shapes=[pltpu.VMEM((T, 1), jnp.float32),
                        pltpu.VMEM((T, 1), jnp.float32),
                        pltpu.VMEM((T, Dh), jnp.float32)],
        compiler_params=pltpu.CompilerParams(
            dimension_semantics=("parallel", "parallel", "arbitrary"),
            vmem_limit_bytes=_VMEM_LIMIT),
    )(*args)


def _ln_kernel(x_ref, g_ref, b_ref, o_ref, *, eps):
    """Plain LayerNorm over the last axis, f32 math (used only for the final norm)."""
    z = x_ref[...].astype(jnp.float32)
    mu = jnp.mean(z, axis=-1, keepdims=True)
    var = jnp.mean((z - mu) ** 2, axis=-1, keepdims=True)
    zn = (z - mu) * jax.lax.rsqrt(var + eps)
    o_ref[...] = (zn * g_ref[...] + b_ref[...]).astype(o_ref.dtype)


def layernorm(x, gamma, beta, eps=1e-5, tm=256, out_dtype=None):
    M, E = x.shape
    tm = _tile(M, tm, align=8)
    out_dtype = out_dtype or x.dtype
    return pl.pallas_call(
        functools.partial(_ln_kernel, eps=eps),
        out_shape=jax.ShapeDtypeStruct((M, E), out_dtype),
        grid=(M // tm,),
        in_specs=[pl.BlockSpec((tm, E), lambda i: (i, 0)),
                  pl.BlockSpec((1, E), lambda i: (0, 0)),
                  pl.BlockSpec((1, E), lambda i: (0, 0))],
        out_specs=pl.BlockSpec((tm, E), lambda i: (i, 0)),
        compiler_params=pltpu.CompilerParams(
            dimension_semantics=("parallel",),
            vmem_limit_bytes=_VMEM_LIMIT),
    )(x, gamma.reshape(1, E), beta.reshape(1, E))


# ---------------------------------------------------------------------------
# Model wrappers (layout glue in XLA, compute in Pallas kernels above)
# ---------------------------------------------------------------------------

def decoder_layer(x3, memory, lp, nhead, tgt_mask, memory_mask):
    N, T, E = x3.shape
    S = memory.shape[1]
    H = nhead
    Dh = E // H
    M = N * T
    x = x3.reshape(M, E)                                           # bf16

    # ---- self attention (fused QKV; heads exposed via one reshape/transpose) ----
    sp = lp["self_attn"]
    qkv = linear(x, sp["w_qkv"], sp["b_qkv"])                      # (M, 3E) bf16
    qkv_g = qkv.reshape(N, T, 3, H, Dh).transpose(2, 0, 3, 1, 4).reshape(3 * N * H, T, Dh)
    sa = attention(qkv_g, qkv_g, n_batch=N, n_heads=H,
                   q_off=0, k_off=N * H, v_off=2 * N * H,
                   causal=True, mask=tgt_mask)                     # (N*H, T, Dh)
    sa = sa.reshape(N, H, T, Dh).transpose(0, 2, 1, 3).reshape(M, E)
    # TODO(synk): dropout1 is identity (inference mode).
    x = proj_residual_ln(sa, sp["wo"], sp["bo"], x, lp["ln1_g"], lp["ln1_b"])

    # ---- cross attention (fused KV projection of memory) ----
    cp = lp["cross_attn"]
    q = linear(x, cp["wq"], cp["bq"])                              # (M, E) bf16
    q_g = q.reshape(N, T, H, Dh).transpose(0, 2, 1, 3).reshape(N * H, T, Dh)
    kv = linear(memory.reshape(N * S, E), cp["w_kv"], cp["b_kv"])  # (N*S, 2E) bf16
    kv_g = kv.reshape(N, S, 2, H, Dh).transpose(2, 0, 3, 1, 4).reshape(2 * N * H, S, Dh)
    ca = attention(q_g, kv_g, n_batch=N, n_heads=H,
                   q_off=0, k_off=0, v_off=N * H,
                   causal=False, mask=memory_mask)                 # (N*H, T, Dh)
    ca = ca.reshape(N, H, T, Dh).transpose(0, 2, 1, 3).reshape(M, E)
    # TODO(synk): dropout2 is identity (inference mode).
    x = proj_residual_ln(ca, cp["wo"], cp["bo"], x, lp["ln2_g"], lp["ln2_b"])

    # ---- feed forward (fused matmul1+relu+matmul2+residual+LN, FF-chunked) ----
    x = ffn_residual_ln(x, lp["ffn"], lp["ln3_g"], lp["ln3_b"])
    return x.reshape(N, T, E)


def decoder_forward(tgt, memory, params, nhead, tgt_mask=None, memory_mask=None):
    N, T, E = tgt.shape
    x = tgt.astype(jnp.bfloat16)          # bf16 activations end-to-end
    mem = memory.astype(jnp.bfloat16)
    tm = None if tgt_mask is None else tgt_mask.astype(jnp.float32)      # True/1.0 = attend
    mm = None if memory_mask is None else memory_mask.astype(jnp.float32)
    for lp in params["layers"]:
        x = decoder_layer(x, mem, lp, nhead, tm, mm)
    out = layernorm(x.reshape(N * T, E), params["ln_g"], params["ln_b"],
                    out_dtype=jnp.float32)
    return out.reshape(N, T, E)


# ---------------------------------------------------------------------------
# Deterministic parameter init (weights bf16 for MXU, biases/LN params f32)
# ---------------------------------------------------------------------------

def init_params(key, d_model, nhead, num_layers, dim_feedforward):
    def dense(k, din, dout):
        return (0.05 * jax.random.normal(k, (din, dout), jnp.float32)).astype(jnp.bfloat16)

    layers = []
    keys = jax.random.split(key, num_layers + 1)
    for li in range(num_layers):
        ks = jax.random.split(keys[li], 10)
        wq_s, wk_s, wv_s, wo_s = (dense(ks[i], d_model, d_model) for i in range(4))
        wq_c, wk_c, wv_c, wo_c = (dense(ks[i], d_model, d_model) for i in range(4, 8))
        zeros_e = jnp.zeros((d_model,), jnp.float32)
        layers.append({
            "self_attn": {
                "w_qkv": jnp.concatenate([wq_s, wk_s, wv_s], axis=1),   # (E, 3E)
                "b_qkv": jnp.zeros((3 * d_model,), jnp.float32),
                "wo": wo_s, "bo": zeros_e,
            },
            "cross_attn": {
                "wq": wq_c, "bq": zeros_e,
                "w_kv": jnp.concatenate([wk_c, wv_c], axis=1),          # (E, 2E)
                "b_kv": jnp.zeros((2 * d_model,), jnp.float32),
                "wo": wo_c, "bo": zeros_e,
            },
            "ffn": {
                "w1": dense(ks[8], d_model, dim_feedforward),
                "b1": jnp.zeros((dim_feedforward,), jnp.float32),
                "w2": dense(ks[9], dim_feedforward, d_model),
                "b2": zeros_e,
            },
            "ln1_g": jnp.ones((d_model,), jnp.float32), "ln1_b": zeros_e,
            "ln2_g": jnp.ones((d_model,), jnp.float32), "ln2_b": zeros_e,
            "ln3_g": jnp.ones((d_model,), jnp.float32), "ln3_b": zeros_e,
        })
    return {
        "layers": layers,
        "ln_g": jnp.ones((d_model,), jnp.float32),
        "ln_b": jnp.zeros((d_model,), jnp.float32),
    }


# ---------------------------------------------------------------------------
# Main
# ---------------------------------------------------------------------------

if __name__ == "__main__":
    d_model, nhead, num_layers, dim_feedforward = 32, 4, 2, 64
    N, T, S = 2, 8, 8

    key = jax.random.PRNGKey(0)
    k_tgt, k_mem, k_par = jax.random.split(key, 3)
    tgt = jax.random.normal(k_tgt, (N, T, d_model), jnp.float32)
    memory = jax.random.normal(k_mem, (N, S, d_model), jnp.float32)
    params = init_params(k_par, d_model, nhead, num_layers, dim_feedforward)

    fwd = jax.jit(lambda t, m, p: decoder_forward(t, m, p, nhead))
    out = jax.block_until_ready(fwd(tgt, memory, params))

    assert out.shape == (N, T, d_model)
    assert bool(jnp.all(jnp.isfinite(out)))
    print("KERNEL_OK")
</pallas_src>

<mosaic_0001>
module attributes {stable_mosaic.version = 11 : i64} {
  func.func @_linear_kernel(%arg0: i32, %arg1: i32, %arg2: i32, %arg3: memref<16x32xbf16, #tpu.memory_space<vmem>>, %arg4: memref<32x96xbf16, #tpu.memory_space<vmem>>, %arg5: memref<1x96xf32, #tpu.memory_space<vmem>>, %arg6: memref<16x96xbf16, #tpu.memory_space<vmem>>, %arg7: memref<16x96xf32, #tpu.memory_space<vmem>>) attributes {dimension_semantics = [#tpu.dimension_semantics<parallel>, #tpu.dimension_semantics<parallel>, #tpu.dimension_semantics<arbitrary>], iteration_bounds = array<i64: 1, 1, 1>, scalar_prefetch = 0 : i64, scratch_operands = 1 : i64, tpu.core_type = #tpu.core_type<tc>, window_params = [{transform_indices = @transform_0, window_bounds = array<i64: 16, 32>}, {transform_indices = @transform_1, window_bounds = array<i64: 32, 96>}, {transform_indices = @transform_2, window_bounds = array<i64: 1, 96>}, {transform_indices = @transform_3, window_bounds = array<i64: 16, 96>}]} {
    %c0_i32 = arith.constant 0 : i32
    %0 = arith.cmpi eq, %arg2, %c0_i32 : i32
    %1 = arith.extui %0 : i1 to i32
    %c0_i32_0 = arith.constant 0 : i32
    %2 = arith.cmpi ne, %1, %c0_i32_0 : i32
    scf.if %2 {
      %cst_10 = arith.constant 0.000000e+00 : f32
      %12 = vector.broadcast %cst_10 : f32 to vector<16x96xf32>
      %c0_11 = arith.constant 0 : index
      %c0_12 = arith.constant 0 : index
      %13 = vector.load %arg7[%c0_11, %c0_12] : memref<16x96xf32, #tpu.memory_space<vmem>>, vector<16x96xf32>
      tpu.vector_store %arg7[%c0_11, %c0_12], %12 {strides = array<i32>} : memref<16x96xf32, #tpu.memory_space<vmem>>, vector<16x96xf32>,
    } else {
    }
    %c0 = arith.constant 0 : index
    %c0_1 = arith.constant 0 : index
    %3 = vector.load %arg7[%c0, %c0_1] : memref<16x96xf32, #tpu.memory_space<vmem>>, vector<16x96xf32>
    %c0_2 = arith.constant 0 : index
    %c0_3 = arith.constant 0 : index
    %4 = vector.load %arg3[%c0_2, %c0_3] : memref<16x32xbf16, #tpu.memory_space<vmem>>, vector<16x32xbf16>
    %c0_4 = arith.constant 0 : index
    %c0_5 = arith.constant 0 : index
    %5 = vector.load %arg4[%c0_4, %c0_5] : memref<32x96xbf16, #tpu.memory_space<vmem>>, vector<32x96xbf16>
    %cst = arith.constant dense<0.000000e+00> : vector<16x96xf32>
    %6 = tpu.matmul %4, %5, %cst {dimension_numbers = #tpu.dot_dimension_numbers<[1], [0], [0], [1], [0, 0, 1, 1], [], []>} : vector<16x32xbf16>, vector<32x96xbf16>, vector<16x96xf32> -> vector<16x96xf32>
    %7 = arith.addf %3, %6 : vector<16x96xf32>
    %c0_6 = arith.constant 0 : index
    %c0_7 = arith.constant 0 : index
    %8 = vector.load %arg7[%c0_6, %c0_7] : memref<16x96xf32, #tpu.memory_space<vmem>>, vector<16x96xf32>
    tpu.vector_store %arg7[%c0_6, %c0_7], %7 {strides = array<i32>} : memref<16x96xf32, #tpu.memory_space<vmem>>, vector<16x96xf32>,
    %c0_i32_8 = arith.constant 0 : i32
    %9 = arith.cmpi eq, %arg2, %c0_i32_8 : i32
    %10 = arith.extui %9 : i1 to i32
    %c0_i32_9 = arith.constant 0 : i32
    %11 = arith.cmpi ne, %10, %c0_i32_9 : i32
    scf.if %11 {
      %c0_10 = arith.constant 0 : index
      %c0_11 = arith.constant 0 : index
      %12 = vector.load %arg7[%c0_10, %c0_11] : memref<16x96xf32, #tpu.memory_space<vmem>>, vector<16x96xf32>
      %c0_12 = arith.constant 0 : index
      %c0_13 = arith.constant 0 : index
      %13 = vector.load %arg5[%c0_12, %c0_13] : memref<1x96xf32, #tpu.memory_space<vmem>>, vector<1x96xf32>
      %14 = vector.broadcast %13 : vector<1x96xf32> to vector<16x96xf32>
      %15 = arith.addf %12, %14 : vector<16x96xf32>
      %16 = arith.truncf %15 : vector<16x96xf32> to vector<16x96xbf16>
      %c0_14 = arith.constant 0 : index
      %c0_15 = arith.constant 0 : index
      %17 = vector.load %arg6[%c0_14, %c0_15] : memref<16x96xbf16, #tpu.memory_space<vmem>>, vector<16x96xbf16>
      tpu.vector_store %arg6[%c0_14, %c0_15], %16 {strides = array<i32>} : memref<16x96xbf16, #tpu.memory_space<vmem>>, vector<16x96xbf16>,
    } else {
    }
    return
  }
  func.func @transform_0(%arg0: i32, %arg1: i32, %arg2: i32) -> (i32, i32) {
    %c0_i32 = arith.constant 0 : i32
    return %arg0, %arg2 : i32, i32
  }
  func.func @transform_1(%arg0: i32, %arg1: i32, %arg2: i32) -> (i32, i32) {
    %c0_i32 = arith.constant 0 : i32
    return %arg2, %arg1 : i32, i32
  }
  func.func @transform_2(%arg0: i32, %arg1: i32, %arg2: i32) -> (i32, i32) {
    %c0_i32 = arith.constant 0 : i32
    %c0_i32_0 = arith.constant 0 : i32
    return %c0_i32, %arg1 : i32, i32
  }
  func.func @transform_3(%arg0: i32, %arg1: i32, %arg2: i32) -> (i32, i32) {
    %c0_i32 = arith.constant 0 : i32
    return %arg0, %arg1 : i32, i32
  }
}

module attributes {stable_mosaic.version = 11 : i64} {
  func.func @_attn_kernel(%arg0: i32, %arg1: i32, %arg2: i32, %arg3: memref<1x8x8xbf16, #tpu.memory_space<vmem>>, %arg4: memref<1x8x8xbf16, #tpu.memory_space<vmem>>, %arg5: memref<1x8x8xbf16, #tpu.memory_space<vmem>>, %arg6: memref<1x8x8xbf16, #tpu.memory_space<vmem>>, %arg7: memref<8x1xf32, #tpu.memory_space<vmem>>, %arg8: memref<8x1xf32, #tpu.memory_space<vmem>>, %arg9: memref<8x8xf32, #tpu.memory_space<vmem>>) attributes {dimension_semantics = [#tpu.dimension_semantics<parallel>, #tpu.dimension_semantics<parallel>, #tpu.dimension_semantics<arbitrary>], iteration_bounds = array<i64: 2, 4, 1>, scalar_prefetch = 0 : i64, scratch_operands = 3 : i64, tpu.core_type = #tpu.core_type<tc>, window_params = [{transform_indices = @transform_0, window_bounds = array<i64: 1, 8, 8>}, {transform_indices = @transform_1, window_bounds = array<i64: 1, 8, 8>}, {transform_indices = @transform_2, window_bounds = array<i64: 1, 8, 8>}, {transform_indices = @transform_3, window_bounds = array<i64: 1, 8, 8>}]} {
    %c0_i32 = arith.constant 0 : i32
    %0 = arith.cmpi eq, %arg2, %c0_i32 : i32
    %1 = arith.extui %0 : i1 to i32
    %c0_i32_0 = arith.constant 0 : i32
    %2 = arith.cmpi ne, %1, %c0_i32_0 : i32
    scf.if %2 {
      %cst_28 = arith.constant 0xFF800000 : f32
      %46 = vector.broadcast %cst_28 : f32 to vector<8x1xf32>
      %c0_29 = arith.constant 0 : index
      %c0_30 = arith.constant 0 : index
      %47 = vector.load %arg7[%c0_29, %c0_30] : memref<8x1xf32, #tpu.memory_space<vmem>>, vector<8x1xf32>
      tpu.vector_store %arg7[%c0_29, %c0_30], %46 {strides = array<i32>} : memref<8x1xf32, #tpu.memory_space<vmem>>, vector<8x1xf32>,
      %cst_31 = arith.constant 0.000000e+00 : f32
      %48 = vector.broadcast %cst_31 : f32 to vector<8x1xf32>
      %c0_32 = arith.constant 0 : index
      %c0_33 = arith.constant 0 : index
      %49 = vector.load %arg8[%c0_32, %c0_33] : memref<8x1xf32, #tpu.memory_space<vmem>>, vector<8x1xf32>
      tpu.vector_store %arg8[%c0_32, %c0_33], %48 {strides = array<i32>} : memref<8x1xf32, #tpu.memory_space<vmem>>, vector<8x1xf32>,
      %cst_34 = arith.constant 0.000000e+00 : f32
      %50 = vector.broadcast %cst_34 : f32 to vector<8x8xf32>
      %c0_35 = arith.constant 0 : index
      %c0_36 = arith.constant 0 : index
      %51 = vector.load %arg9[%c0_35, %c0_36] : memref<8x8xf32, #tpu.memory_space<vmem>>, vector<8x8xf32>
      tpu.vector_store %arg9[%c0_35, %c0_36], %50 {strides = array<i32>} : memref<8x8xf32, #tpu.memory_space<vmem>>, vector<8x8xf32>,
    } else {
    }
    %c0 = arith.constant 0 : index
    %c0_1 = arith.constant 0 : index
    %c0_2 = arith.constant 0 : index
    %3 = vector.load %arg3[%c0, %c0_1, %c0_2] : memref<1x8x8xbf16, #tpu.memory_space<vmem>>, vector<1x8x8xbf16>
    %4 = vector.shape_cast %3 : vector<1x8x8xbf16> to vector<8x8xbf16>
    %c0_3 = arith.constant 0 : index
    %c0_4 = arith.constant 0 : index
    %c0_5 = arith.constant 0 : index
    %5 = vector.load %arg4[%c0_3, %c0_4, %c0_5] : memref<1x8x8xbf16, #tpu.memory_space<vmem>>, vector<1x8x8xbf16>
    %6 = vector.shape_cast %5 : vector<1x8x8xbf16> to vector<8x8xbf16>
    %c0_6 = arith.constant 0 : index
    %c0_7 = arith.constant 0 : index
    %c0_8 = arith.constant 0 : index
    %7 = vector.load %arg5[%c0_6, %c0_7, %c0_8] : memref<1x8x8xbf16, #tpu.memory_space<vmem>>, vector<1x8x8xbf16>
    %8 = vector.shape_cast %7 : vector<1x8x8xbf16> to vector<8x8xbf16>
    %cst = arith.constant dense<0.000000e+00> : vector<8x8xf32>
    %9 = tpu.matmul %4, %6, %cst {dimension_numbers = #tpu.dot_dimension_numbers<[1], [1], [0], [0], [0, 0, 1, 0], [], []>} : vector<8x8xbf16>, vector<8x8xbf16>, vector<8x8xf32> -> vector<8x8xf32>
    %cst_9 = arith.constant 0.353553385 : f32
    %10 = vector.broadcast %cst_9 : f32 to vector<8x8xf32>
    %11 = arith.mulf %9, %10 : vector<8x8xf32>
    %12 = tpu.iota {dimensions = array<i32: 0>} : vector<8x8xi32>
    %13 = tpu.iota {dimensions = array<i32: 1>} : vector<8x8xi32>
    %c8_i32 = arith.constant 8 : i32
    %14 = arith.muli %arg2, %c8_i32 : i32
    %15 = vector.broadcast %14 : i32 to vector<8x8xi32>
    %16 = arith.addi %13, %15 : vector<8x8xi32>
    %17 = arith.cmpi sge, %12, %16 : vector<8x8xi32>
    %cst_10 = arith.constant -1.000000e+30 : f32
    %18 = vector.broadcast %cst_10 : f32 to vector<8x8xf32>
    %19 = arith.select %17, %11, %18 : vector<8x8xi1>, vector<8x8xf32>
    %c0_11 = arith.constant 0 : index
    %c0_12 = arith.constant 0 : index
    %20 = vector.load %arg7[%c0_11, %c0_12] : memref<8x1xf32, #tpu.memory_space<vmem>>, vector<8x1xf32>
    %cst_13 = arith.constant dense<0xFF800000> : vector<8xf32>
    %21 = vector.multi_reduction <maximumf>, %19, %cst_13 [1] : vector<8x8xf32> to vector<8xf32>
    %22 = vector.shape_cast %21 : vector<8xf32> to vector<8x1xf32>
    %23 = arith.maximumf %20, %22 : vector<8x1xf32>
    %24 = arith.subf %20, %23 : vector<8x1xf32>
    %25 = math.exp %24 : vector<8x1xf32>
    %26 = vector.broadcast %23 : vector<8x1xf32> to vector<8x8xf32>
    %27 = arith.subf %19, %26 : vector<8x8xf32>
    %28 = math.exp %27 : vector<8x8xf32>
    %c0_14 = arith.constant 0 : index
    %c0_15 = arith.constant 0 : index
    %29 = vector.load %arg8[%c0_14, %c0_15] : memref<8x1xf32, #tpu.memory_space<vmem>>, vector<8x1xf32>
    %30 = arith.mulf %25, %29 : vector<8x1xf32>
    %cst_16 = arith.constant dense<0.000000e+00> : vector<8xf32>
    %31 = vector.multi_reduction <add>, %28, %cst_16 [1] : vector<8x8xf32> to vector<8xf32>
    %32 = vector.shape_cast %31 : vector<8xf32> to vector<8x1xf32>
    %33 = arith.addf %30, %32 : vector<8x1xf32>
    %c0_17 = arith.constant 0 : index
    %c0_18 = arith.constant 0 : index
    %34 = vector.load %arg8[%c0_17, %c0_18] : memref<8x1xf32, #tpu.memory_space<vmem>>, vector<8x1xf32>
    tpu.vector_store %arg8[%c0_17, %c0_18], %33 {strides = array<i32>} : memref<8x1xf32, #tpu.memory_space<vmem>>, vector<8x1xf32>,
    %c0_19 = arith.constant 0 : index
    %c0_20 = arith.constant 0 : index
    %35 = vector.load %arg9[%c0_19, %c0_20] : memref<8x8xf32, #tpu.memory_space<vmem>>, vector<8x8xf32>
    %36 = vector.broadcast %25 : vector<8x1xf32> to vector<8x8xf32>
    %37 = arith.mulf %36, %35 : vector<8x8xf32>
    %38 = arith.truncf %28 : vector<8x8xf32> to vector<8x8xbf16>
    %cst_21 = arith.constant dense<0.000000e+00> : vector<8x8xf32>
    %39 = tpu.matmul %38, %8, %cst_21 {dimension_numbers = #tpu.dot_dimension_numbers<[1], [0], [0], [1], [0, 0, 1, 1], [], []>} : vector<8x8xbf16>, vector<8x8xbf16>, vector<8x8xf32> -> vector<8x8xf32>
    %40 = arith.addf %37, %39 : vector<8x8xf32>
    %c0_22 = arith.constant 0 : index
    %c0_23 = arith.constant 0 : index
    %41 = vector.load %arg9[%c0_22, %c0_23] : memref<8x8xf32, #tpu.memory_space<vmem>>, vector<8x8xf32>
    tpu.vector_store %arg9[%c0_22, %c0_23], %40 {strides = array<i32>} : memref<8x8xf32, #tpu.memory_space<vmem>>, vector<8x8xf32>,
    %c0_24 = arith.constant 0 : index
    %c0_25 = arith.constant 0 : index
    %42 = vector.load %arg7[%c0_24, %c0_25] : memref<8x1xf32, #tpu.memory_space<vmem>>, vector<8x1xf32>
    tpu.vector_store %arg7[%c0_24, %c0_25], %23 {strides = array<i32>} : memref<8x1xf32, #tpu.memory_space<vmem>>, vector<8x1xf32>,
    %c0_i32_26 = arith.constant 0 : i32
    %43 = arith.cmpi eq, %arg2, %c0_i32_26 : i32
    %44 = arith.extui %43 : i1 to i32
    %c0_i32_27 = arith.constant 0 : i32
    %45 = arith.cmpi ne, %44, %c0_i32_27 : i32
    scf.if %45 {
      %c0_28 = arith.constant 0 : index
      %c0_29 = arith.constant 0 : index
      %46 = vector.load %arg9[%c0_28, %c0_29] : memref<8x8xf32, #tpu.memory_space<vmem>>, vector<8x8xf32>
      %c0_30 = arith.constant 0 : index
      %c0_31 = arith.constant 0 : index
      %47 = vector.load %arg8[%c0_30, %c0_31] : memref<8x1xf32, #tpu.memory_space<vmem>>, vector<8x1xf32>
      %48 = tpu.reciprocal %47 {approx = true} : vector<8x1xf32> -> vector<8x1xf32>
      %49 = vector.broadcast %48 : vector<8x1xf32> to vector<8x8xf32>
      %50 = arith.mulf %46, %49 : vector<8x8xf32>
      %51 = arith.truncf %50 : vector<8x8xf32> to vector<8x8xbf16>
      %c0_32 = arith.constant 0 : index
      %c0_33 = arith.constant 0 : index
      %c0_34 = arith.constant 0 : index
      %52 = vector.load %arg6[%c0_32, %c0_33, %c0_34] : memref<1x8x8xbf16, #tpu.memory_space<vmem>>, vector<1x8x8xbf16>
      %53 = vector.shape_cast %52 : vector<1x8x8xbf16> to vector<8x8xbf16>
      %54 = vector.shape_cast %51 : vector<8x8xbf16> to vector<1x8x8xbf16>
      tpu.vector_store %arg6[%c0_32, %c0_33, %c0_34], %54 {strides = array<i32>} : memref<1x8x8xbf16, #tpu.memory_space<vmem>>, vector<1x8x8xbf16>,
    } else {
    }
    return
  }
  func.func @transform_0(%arg0: i32, %arg1: i32, %arg2: i32) -> (i32, i32, i32) {
    %c4_i32 = arith.constant 4 : i32
    %0 = arith.muli %arg0, %c4_i32 : i32
    %c0_i32 = arith.constant 0 : i32
    %1 = arith.addi %c0_i32, %0 : i32
    %2 = arith.addi %1, %arg1 : i32
    %c0_i32_0 = arith.constant 0 : i32
    %c0_i32_1 = arith.constant 0 : i32
    %c0_i32_2 = arith.constant 0 : i32
    return %2, %c0_i32_0, %c0_i32_1 : i32, i32, i32
  }
  func.func @transform_1(%arg0: i32, %arg1: i32, %arg2: i32) -> (i32, i32, i32) {
    %c4_i32 = arith.constant 4 : i32
    %0 = arith.muli %arg0, %c4_i32 : i32
    %c8_i32 = arith.constant 8 : i32
    %1 = arith.addi %c8_i32, %0 : i32
    %2 = arith.addi %1, %arg1 : i32
    %c0_i32 = arith.constant 0 : i32
    %c0_i32_0 = arith.constant 0 : i32
    return %2, %arg2, %c0_i32 : i32, i32, i32
  }
  func.func @transform_2(%arg0: i32, %arg1: i32, %arg2: i32) -> (i32, i32, i32) {
    %c4_i32 = arith.constant 4 : i32
    %0 = arith.muli %arg0, %c4_i32 : i32
    %c16_i32 = arith.constant 16 : i32
    %1 = arith.addi %c16_i32, %0 : i32
    %2 = arith.addi %1, %arg1 : i32
    %c0_i32 = arith.constant 0 : i32
    %c0_i32_0 = arith.constant 0 : i32
    return %2, %arg2, %c0_i32 : i32, i32, i32
  }
  func.func @transform_3(%arg0: i32, %arg1: i32, %arg2: i32) -> (i32, i32, i32) {
    %c4_i32 = arith.constant 4 : i32
    %0 = arith.muli %arg0, %c4_i32 : i32
    %1 = arith.addi %0, %arg1 : i32
    %c0_i32 = arith.constant 0 : i32
    %c0_i32_0 = arith.constant 0 : i32
    %c0_i32_1 = arith.constant 0 : i32
    return %1, %c0_i32, %c0_i32_0 : i32, i32, i32
  }
}

module attributes {stable_mosaic.version = 11 : i64} {
  func.func @_proj_res_ln_kernel(%arg0: i32, %arg1: i32, %arg2: memref<16x32xbf16, #tpu.memory_space<vmem>>, %arg3: memref<32x32xbf16, #tpu.memory_space<vmem>>, %arg4: memref<1x32xf32, #tpu.memory_space<vmem>>, %arg5: memref<16x32xbf16, #tpu.memory_space<vmem>>, %arg6: memref<1x32xf32, #tpu.memory_space<vmem>>, %arg7: memref<1x32xf32, #tpu.memory_space<vmem>>, %arg8: memref<16x32xbf16, #tpu.memory_space<vmem>>, %arg9: memref<16x32xf32, #tpu.memory_space<vmem>>) attributes {dimension_semantics = [#tpu.dimension_semantics<parallel>, #tpu.dimension_semantics<arbitrary>], iteration_bounds = array<i64: 1, 1>, scalar_prefetch = 0 : i64, scratch_operands = 1 : i64, tpu.core_type = #tpu.core_type<tc>, window_params = [{transform_indices = @transform_0, window_bounds = array<i64: 16, 32>}, {transform_indices = @transform_1, window_bounds = array<i64: 32, 32>}, {pipeline_mode = #tpu.pipeline_mode<synchronous>, transform_indices = @transform_2, window_bounds = array<i64: 1, 32>}, {transform_indices = @transform_3, window_bounds = array<i64: 16, 32>}, {pipeline_mode = #tpu.pipeline_mode<synchronous>, transform_indices = @transform_4, window_bounds = array<i64: 1, 32>}, {pipeline_mode = #tpu.pipeline_mode<synchronous>, transform_indices = @transform_5, window_bounds = array<i64: 1, 32>}, {transform_indices = @transform_6, window_bounds = array<i64: 16, 32>}]} {
    %c0_i32 = arith.constant 0 : i32
    %0 = arith.cmpi eq, %arg1, %c0_i32 : i32
    %1 = arith.extui %0 : i1 to i32
    %c0_i32_0 = arith.constant 0 : i32
    %2 = arith.cmpi ne, %1, %c0_i32_0 : i32
    scf.if %2 {
      %cst_10 = arith.constant 0.000000e+00 : f32
      %12 = vector.broadcast %cst_10 : f32 to vector<16x32xf32>
      %c0_11 = arith.constant 0 : index
      %c0_12 = arith.constant 0 : index
      %13 = vector.load %arg9[%c0_11, %c0_12] : memref<16x32xf32, #tpu.memory_space<vmem>>, vector<16x32xf32>
      tpu.vector_store %arg9[%c0_11, %c0_12], %12 {strides = array<i32>} : memref<16x32xf32, #tpu.memory_space<vmem>>, vector<16x32xf32>,
    } else {
    }
    %c0 = arith.constant 0 : index
    %c0_1 = arith.constant 0 : index
    %3 = vector.load %arg9[%c0, %c0_1] : memref<16x32xf32, #tpu.memory_space<vmem>>, vector<16x32xf32>
    %c0_2 = arith.constant 0 : index
    %c0_3 = arith.constant 0 : index
    %4 = vector.load %arg2[%c0_2, %c0_3] : memref<16x32xbf16, #tpu.memory_space<vmem>>, vector<16x32xbf16>
    %c0_4 = arith.constant 0 : index
    %c0_5 = arith.constant 0 : index
    %5 = vector.load %arg3[%c0_4, %c0_5] : memref<32x32xbf16, #tpu.memory_space<vmem>>, vector<32x32xbf16>
    %cst = arith.constant dense<0.000000e+00> : vector<16x32xf32>
    %6 = tpu.matmul %4, %5, %cst {dimension_numbers = #tpu.dot_dimension_numbers<[1], [0], [0], [1], [0, 0, 1, 1], [], []>} : vector<16x32xbf16>, vector<32x32xbf16>, vector<16x32xf32> -> vector<16x32xf32>
    %7 = arith.addf %3, %6 : vector<16x32xf32>
    %c0_6 = arith.constant 0 : index
    %c0_7 = arith.constant 0 : index
    %8 = vector.load %arg9[%c0_6, %c0_7] : memref<16x32xf32, #tpu.memory_space<vmem>>, vector<16x32xf32>
    tpu.vector_store %arg9[%c0_6, %c0_7], %7 {strides = array<i32>} : memref<16x32xf32, #tpu.memory_space<vmem>>, vector<16x32xf32>,
    %c0_i32_8 = arith.constant 0 : i32
    %9 = arith.cmpi eq, %arg1, %c0_i32_8 : i32
    %10 = arith.extui %9 : i1 to i32
    %c0_i32_9 = arith.constant 0 : i32
    %11 = arith.cmpi ne, %10, %c0_i32_9 : i32
    scf.if %11 {
      %c0_10 = arith.constant 0 : index
      %c0_11 = arith.constant 0 : index
      %12 = vector.load %arg9[%c0_10, %c0_11] : memref<16x32xf32, #tpu.memory_space<vmem>>, vector<16x32xf32>
      %c0_12 = arith.constant 0 : index
      %c0_13 = arith.constant 0 : index
      %13 = vector.load %arg4[%c0_12, %c0_13] : memref<1x32xf32, #tpu.memory_space<vmem>>, vector<1x32xf32>
      %14 = vector.broadcast %13 : vector<1x32xf32> to vector<16x32xf32>
      %15 = arith.addf %12, %14 : vector<16x32xf32>
      %c0_14 = arith.constant 0 : index
      %c0_15 = arith.constant 0 : index
      %16 = vector.load %arg5[%c0_14, %c0_15] : memref<16x32xbf16, #tpu.memory_space<vmem>>, vector<16x32xbf16>
      %17 = arith.extf %16 : vector<16x32xbf16> to vector<16x32xf32>
      %18 = arith.addf %15, %17 : vector<16x32xf32>
      %cst_16 = arith.constant dense<0.000000e+00> : vector<16xf32>
      %19 = vector.multi_reduction <add>, %18, %cst_16 [1] : vector<16x32xf32> to vector<16xf32>
      %20 = vector.shape_cast %19 : vector<16xf32> to vector<16x1xf32>
      %cst_17 = arith.constant 3.200000e+01 : f32
      %21 = vector.broadcast %cst_17 : f32 to vector<16x1xf32>
      %22 = arith.divf %20, %21 : vector<16x1xf32>
      %23 = vector.broadcast %22 : vector<16x1xf32> to vector<16x32xf32>
      %24 = arith.subf %18, %23 : vector<16x32xf32>
      %25 = arith.mulf %24, %24 : vector<16x32xf32>
      %cst_18 = arith.constant dense<0.000000e+00> : vector<16xf32>
      %26 = vector.multi_reduction <add>, %25, %cst_18 [1] : vector<16x32xf32> to vector<16xf32>
      %27 = vector.shape_cast %26 : vector<16xf32> to vector<16x1xf32>
      %cst_19 = arith.constant 3.200000e+01 : f32
      %28 = vector.broadcast %cst_19 : f32 to vector<16x1xf32>
      %29 = arith.divf %27, %28 : vector<16x1xf32>
      %30 = vector.broadcast %22 : vector<16x1xf32> to vector<16x32xf32>
      %31 = arith.subf %18, %30 : vector<16x32xf32>
      %cst_20 = arith.constant 9.99999974E-6 : f32
      %32 = vector.broadcast %cst_20 : f32 to vector<16x1xf32>
      %33 = arith.addf %29, %32 : vector<16x1xf32>
      %34 = math.rsqrt %33 : vector<16x1xf32>
      %35 = vector.broadcast %34 : vector<16x1xf32> to vector<16x32xf32>
      %36 = arith.mulf %31, %35 : vector<16x32xf32>
      %c0_21 = arith.constant 0 : index
      %c0_22 = arith.constant 0 : index
      %37 = vector.load %arg6[%c0_21, %c0_22] : memref<1x32xf32, #tpu.memory_space<vmem>>, vector<1x32xf32>
      %38 = vector.broadcast %37 : vector<1x32xf32> to vector<16x32xf32>
      %39 = arith.mulf %36, %38 : vector<16x32xf32>
      %c0_23 = arith.constant 0 : index
      %c0_24 = arith.constant 0 : index
      %40 = vector.load %arg7[%c0_23, %c0_24] : memref<1x32xf32, #tpu.memory_space<vmem>>, vector<1x32xf32>
      %41 = vector.broadcast %40 : vector<1x32xf32> to vector<16x32xf32>
      %42 = arith.addf %39, %41 : vector<16x32xf32>
      %43 = arith.truncf %42 : vector<16x32xf32> to vector<16x32xbf16>
      %c0_25 = arith.constant 0 : index
      %c0_26 = arith.constant 0 : index
      %44 = vector.load %arg8[%c0_25, %c0_26] : memref<16x32xbf16, #tpu.memory_space<vmem>>, vector<16x32xbf16>
      tpu.vector_store %arg8[%c0_25, %c0_26], %43 {strides = array<i32>} : memref<16x32xbf16, #tpu.memory_space<vmem>>, vector<16x32xbf16>,
    } else {
    }
    return
  }
  func.func @transform_0(%arg0: i32, %arg1: i32) -> (i32, i32) {
    %c0_i32 = arith.constant 0 : i32
    return %arg0, %arg1 : i32, i32
  }
  func.func @transform_1(%arg0: i32, %arg1: i32) -> (i32, i32) {
    %c0_i32 = arith.constant 0 : i32
    %c0_i32_0 = arith.constant 0 : i32
    return %arg1, %c0_i32 : i32, i32
  }
  func.func @transform_2(%arg0: i32, %arg1: i32) -> (i32, i32) {
    %c0_i32 = arith.constant 0 : i32
    %c0_i32_0 = arith.constant 0 : i32
    %c0_i32_1 = arith.constant 0 : i32
    return %c0_i32, %c0_i32_0 : i32, i32
  }
  func.func @transform_3(%arg0: i32, %arg1: i32) -> (i32, i32) {
    %c0_i32 = arith.constant 0 : i32
    %c0_i32_0 = arith.constant 0 : i32
    return %arg0, %c0_i32 : i32, i32
  }
  func.func @transform_4(%arg0: i32, %arg1: i32) -> (i32, i32) {
    %c0_i32 = arith.constant 0 : i32
    %c0_i32_0 = arith.constant 0 : i32
    %c0_i32_1 = arith.constant 0 : i32
    return %c0_i32, %c0_i32_0 : i32, i32
  }
  func.func @transform_5(%arg0: i32, %arg1: i32) -> (i32, i32) {
    %c0_i32 = arith.constant 0 : i32
    %c0_i32_0 = arith.constant 0 : i32
    %c0_i32_1 = arith.constant 0 : i32
    return %c0_i32, %c0_i32_0 : i32, i32
  }
  func.func @transform_6(%arg0: i32, %arg1: i32) -> (i32, i32) {
    %c0_i32 = arith.constant 0 : i32
    %c0_i32_0 = arith.constant 0 : i32
    return %arg0, %c0_i32 : i32, i32
  }
}

module attributes {stable_mosaic.version = 11 : i64} {
  func.func @_linear_kernel(%arg0: i32, %arg1: i32, %arg2: i32, %arg3: memref<16x32xbf16, #tpu.memory_space<vmem>>, %arg4: memref<32x32xbf16, #tpu.memory_space<vmem>>, %arg5: memref<1x32xf32, #tpu.memory_space<vmem>>, %arg6: memref<16x32xbf16, #tpu.memory_space<vmem>>, %arg7: memref<16x32xf32, #tpu.memory_space<vmem>>) attributes {dimension_semantics = [#tpu.dimension_semantics<parallel>, #tpu.dimension_semantics<parallel>, #tpu.dimension_semantics<arbitrary>], iteration_bounds = array<i64: 1, 1, 1>, scalar_prefetch = 0 : i64, scratch_operands = 1 : i64, tpu.core_type = #tpu.core_type<tc>, window_params = [{transform_indices = @transform_0, window_bounds = array<i64: 16, 32>}, {transform_indices = @transform_1, window_bounds = array<i64: 32, 32>}, {transform_indices = @transform_2, window_bounds = array<i64: 1, 32>}, {transform_indices = @transform_3, window_bounds = array<i64: 16, 32>}]} {
    %c0_i32 = arith.constant 0 : i32
    %0 = arith.cmpi eq, %arg2, %c0_i32 : i32
    %1 = arith.extui %0 : i1 to i32
    %c0_i32_0 = arith.constant 0 : i32
    %2 = arith.cmpi ne, %1, %c0_i32_0 : i32
    scf.if %2 {
      %cst_10 = arith.constant 0.000000e+00 : f32
      %12 = vector.broadcast %cst_10 : f32 to vector<16x32xf32>
      %c0_11 = arith.constant 0 : index
      %c0_12 = arith.constant 0 : index
      %13 = vector.load %arg7[%c0_11, %c0_12] : memref<16x32xf32, #tpu.memory_space<vmem>>, vector<16x32xf32>
      tpu.vector_store %arg7[%c0_11, %c0_12], %12 {strides = array<i32>} : memref<16x32xf32, #tpu.memory_space<vmem>>, vector<16x32xf32>,
    } else {
    }
    %c0 = arith.constant 0 : index
    %c0_1 = arith.constant 0 : index
    %3 = vector.load %arg7[%c0, %c0_1] : memref<16x32xf32, #tpu.memory_space<vmem>>, vector<16x32xf32>
    %c0_2 = arith.constant 0 : index
    %c0_3 = arith.constant 0 : index
    %4 = vector.load %arg3[%c0_2, %c0_3] : memref<16x32xbf16, #tpu.memory_space<vmem>>, vector<16x32xbf16>
    %c0_4 = arith.constant 0 : index
    %c0_5 = arith.constant 0 : index
    %5 = vector.load %arg4[%c0_4, %c0_5] : memref<32x32xbf16, #tpu.memory_space<vmem>>, vector<32x32xbf16>
    %cst = arith.constant dense<0.000000e+00> : vector<16x32xf32>
    %6 = tpu.matmul %4, %5, %cst {dimension_numbers = #tpu.dot_dimension_numbers<[1], [0], [0], [1], [0, 0, 1, 1], [], []>} : vector<16x32xbf16>, vector<32x32xbf16>, vector<16x32xf32> -> vector<16x32xf32>
    %7 = arith.addf %3, %6 : vector<16x32xf32>
    %c0_6 = arith.constant 0 : index
    %c0_7 = arith.constant 0 : index
    %8 = vector.load %arg7[%c0_6, %c0_7] : memref<16x32xf32, #tpu.memory_space<vmem>>, vector<16x32xf32>
    tpu.vector_store %arg7[%c0_6, %c0_7], %7 {strides = array<i32>} : memref<16x32xf32, #tpu.memory_space<vmem>>, vector<16x32xf32>,
    %c0_i32_8 = arith.constant 0 : i32
    %9 = arith.cmpi eq, %arg2, %c0_i32_8 : i32
    %10 = arith.extui %9 : i1 to i32
    %c0_i32_9 = arith.constant 0 : i32
    %11 = arith.cmpi ne, %10, %c0_i32_9 : i32
    scf.if %11 {
      %c0_10 = arith.constant 0 : index
      %c0_11 = arith.constant 0 : index
      %12 = vector.load %arg7[%c0_10, %c0_11] : memref<16x32xf32, #tpu.memory_space<vmem>>, vector<16x32xf32>
      %c0_12 = arith.constant 0 : index
      %c0_13 = arith.constant 0 : index
      %13 = vector.load %arg5[%c0_12, %c0_13] : memref<1x32xf32, #tpu.memory_space<vmem>>, vector<1x32xf32>
      %14 = vector.broadcast %13 : vector<1x32xf32> to vector<16x32xf32>
      %15 = arith.addf %12, %14 : vector<16x32xf32>
      %16 = arith.truncf %15 : vector<16x32xf32> to vector<16x32xbf16>
      %c0_14 = arith.constant 0 : index
      %c0_15 = arith.constant 0 : index
      %17 = vector.load %arg6[%c0_14, %c0_15] : memref<16x32xbf16, #tpu.memory_space<vmem>>, vector<16x32xbf16>
      tpu.vector_store %arg6[%c0_14, %c0_15], %16 {strides = array<i32>} : memref<16x32xbf16, #tpu.memory_space<vmem>>, vector<16x32xbf16>,
    } else {
    }
    return
  }
  func.func @transform_0(%arg0: i32, %arg1: i32, %arg2: i32) -> (i32, i32) {
    %c0_i32 = arith.constant 0 : i32
    return %arg0, %arg2 : i32, i32
  }
  func.func @transform_1(%arg0: i32, %arg1: i32, %arg2: i32) -> (i32, i32) {
    %c0_i32 = arith.constant 0 : i32
    return %arg2, %arg1 : i32, i32
  }
  func.func @transform_2(%arg0: i32, %arg1: i32, %arg2: i32) -> (i32, i32) {
    %c0_i32 = arith.constant 0 : i32
    %c0_i32_0 = arith.constant 0 : i32
    return %c0_i32, %arg1 : i32, i32
  }
  func.func @transform_3(%arg0: i32, %arg1: i32, %arg2: i32) -> (i32, i32) {
    %c0_i32 = arith.constant 0 : i32
    return %arg0, %arg1 : i32, i32
  }
}

module attributes {stable_mosaic.version = 11 : i64} {
  func.func @_linear_kernel(%arg0: i32, %arg1: i32, %arg2: i32, %arg3: memref<16x32xbf16, #tpu.memory_space<vmem>>, %arg4: memref<32x64xbf16, #tpu.memory_space<vmem>>, %arg5: memref<1x64xf32, #tpu.memory_space<vmem>>, %arg6: memref<16x64xbf16, #tpu.memory_space<vmem>>, %arg7: memref<16x64xf32, #tpu.memory_space<vmem>>) attributes {dimension_semantics = [#tpu.dimension_semantics<parallel>, #tpu.dimension_semantics<parallel>, #tpu.dimension_semantics<arbitrary>], iteration_bounds = array<i64: 1, 1, 1>, scalar_prefetch = 0 : i64, scratch_operands = 1 : i64, tpu.core_type = #tpu.core_type<tc>, window_params = [{transform_indices = @transform_0, window_bounds = array<i64: 16, 32>}, {transform_indices = @transform_1, window_bounds = array<i64: 32, 64>}, {transform_indices = @transform_2, window_bounds = array<i64: 1, 64>}, {transform_indices = @transform_3, window_bounds = array<i64: 16, 64>}]} {
    %c0_i32 = arith.constant 0 : i32
    %0 = arith.cmpi eq, %arg2, %c0_i32 : i32
    %1 = arith.extui %0 : i1 to i32
    %c0_i32_0 = arith.constant 0 : i32
    %2 = arith.cmpi ne, %1, %c0_i32_0 : i32
    scf.if %2 {
      %cst_10 = arith.constant 0.000000e+00 : f32
      %12 = vector.broadcast %cst_10 : f32 to vector<16x64xf32>
      %c0_11 = arith.constant 0 : index
      %c0_12 = arith.constant 0 : index
      %13 = vector.load %arg7[%c0_11, %c0_12] : memref<16x64xf32, #tpu.memory_space<vmem>>, vector<16x64xf32>
      tpu.vector_store %arg7[%c0_11, %c0_12], %12 {strides = array<i32>} : memref<16x64xf32, #tpu.memory_space<vmem>>, vector<16x64xf32>,
    } else {
    }
    %c0 = arith.constant 0 : index
    %c0_1 = arith.constant 0 : index
    %3 = vector.load %arg7[%c0, %c0_1] : memref<16x64xf32, #tpu.memory_space<vmem>>, vector<16x64xf32>
    %c0_2 = arith.constant 0 : index
    %c0_3 = arith.constant 0 : index
    %4 = vector.load %arg3[%c0_2, %c0_3] : memref<16x32xbf16, #tpu.memory_space<vmem>>, vector<16x32xbf16>
    %c0_4 = arith.constant 0 : index
    %c0_5 = arith.constant 0 : index
    %5 = vector.load %arg4[%c0_4, %c0_5] : memref<32x64xbf16, #tpu.memory_space<vmem>>, vector<32x64xbf16>
    %cst = arith.constant dense<0.000000e+00> : vector<16x64xf32>
    %6 = tpu.matmul %4, %5, %cst {dimension_numbers = #tpu.dot_dimension_numbers<[1], [0], [0], [1], [0, 0, 1, 1], [], []>} : vector<16x32xbf16>, vector<32x64xbf16>, vector<16x64xf32> -> vector<16x64xf32>
    %7 = arith.addf %3, %6 : vector<16x64xf32>
    %c0_6 = arith.constant 0 : index
    %c0_7 = arith.constant 0 : index
    %8 = vector.load %arg7[%c0_6, %c0_7] : memref<16x64xf32, #tpu.memory_space<vmem>>, vector<16x64xf32>
    tpu.vector_store %arg7[%c0_6, %c0_7], %7 {strides = array<i32>} : memref<16x64xf32, #tpu.memory_space<vmem>>, vector<16x64xf32>,
    %c0_i32_8 = arith.constant 0 : i32
    %9 = arith.cmpi eq, %arg2, %c0_i32_8 : i32
    %10 = arith.extui %9 : i1 to i32
    %c0_i32_9 = arith.constant 0 : i32
    %11 = arith.cmpi ne, %10, %c0_i32_9 : i32
    scf.if %11 {
      %c0_10 = arith.constant 0 : index
      %c0_11 = arith.constant 0 : index
      %12 = vector.load %arg7[%c0_10, %c0_11] : memref<16x64xf32, #tpu.memory_space<vmem>>, vector<16x64xf32>
      %c0_12 = arith.constant 0 : index
      %c0_13 = arith.constant 0 : index
      %13 = vector.load %arg5[%c0_12, %c0_13] : memref<1x64xf32, #tpu.memory_space<vmem>>, vector<1x64xf32>
      %14 = vector.broadcast %13 : vector<1x64xf32> to vector<16x64xf32>
      %15 = arith.addf %12, %14 : vector<16x64xf32>
      %16 = arith.truncf %15 : vector<16x64xf32> to vector<16x64xbf16>
      %c0_14 = arith.constant 0 : index
      %c0_15 = arith.constant 0 : index
      %17 = vector.load %arg6[%c0_14, %c0_15] : memref<16x64xbf16, #tpu.memory_space<vmem>>, vector<16x64xbf16>
      tpu.vector_store %arg6[%c0_14, %c0_15], %16 {strides = array<i32>} : memref<16x64xbf16, #tpu.memory_space<vmem>>, vector<16x64xbf16>,
    } else {
    }
    return
  }
  func.func @transform_0(%arg0: i32, %arg1: i32, %arg2: i32) -> (i32, i32) {
    %c0_i32 = arith.constant 0 : i32
    return %arg0, %arg2 : i32, i32
  }
  func.func @transform_1(%arg0: i32, %arg1: i32, %arg2: i32) -> (i32, i32) {
    %c0_i32 = arith.constant 0 : i32
    return %arg2, %arg1 : i32, i32
  }
  func.func @transform_2(%arg0: i32, %arg1: i32, %arg2: i32) -> (i32, i32) {
    %c0_i32 = arith.constant 0 : i32
    %c0_i32_0 = arith.constant 0 : i32
    return %c0_i32, %arg1 : i32, i32
  }
  func.func @transform_3(%arg0: i32, %arg1: i32, %arg2: i32) -> (i32, i32) {
    %c0_i32 = arith.constant 0 : i32
    return %arg0, %arg1 : i32, i32
  }
}

module attributes {stable_mosaic.version = 11 : i64} {
  func.func @_attn_kernel(%arg0: i32, %arg1: i32, %arg2: i32, %arg3: memref<1x8x8xbf16, #tpu.memory_space<vmem>>, %arg4: memref<1x8x8xbf16, #tpu.memory_space<vmem>>, %arg5: memref<1x8x8xbf16, #tpu.memory_space<vmem>>, %arg6: memref<1x8x8xbf16, #tpu.memory_space<vmem>>, %arg7: memref<8x1xf32, #tpu.memory_space<vmem>>, %arg8: memref<8x1xf32, #tpu.memory_space<vmem>>, %arg9: memref<8x8xf32, #tpu.memory_space<vmem>>) attributes {dimension_semantics = [#tpu.dimension_semantics<parallel>, #tpu.dimension_semantics<parallel>, #tpu.dimension_semantics<arbitrary>], iteration_bounds = array<i64: 2, 4, 1>, scalar_prefetch = 0 : i64, scratch_operands = 3 : i64, tpu.core_type = #tpu.core_type<tc>, window_params = [{transform_indices = @transform_0, window_bounds = array<i64: 1, 8, 8>}, {transform_indices = @transform_1, window_bounds = array<i64: 1, 8, 8>}, {transform_indices = @transform_2, window_bounds = array<i64: 1, 8, 8>}, {transform_indices = @transform_3, window_bounds = array<i64: 1, 8, 8>}]} {
    %c0_i32 = arith.constant 0 : i32
    %0 = arith.cmpi eq, %arg2, %c0_i32 : i32
    %1 = arith.extui %0 : i1 to i32
    %c0_i32_0 = arith.constant 0 : i32
    %2 = arith.cmpi ne, %1, %c0_i32_0 : i32
    scf.if %2 {
      %cst_27 = arith.constant 0xFF800000 : f32
      %38 = vector.broadcast %cst_27 : f32 to vector<8x1xf32>
      %c0_28 = arith.constant 0 : index
      %c0_29 = arith.constant 0 : index
      %39 = vector.load %arg7[%c0_28, %c0_29] : memref<8x1xf32, #tpu.memory_space<vmem>>, vector<8x1xf32>
      tpu.vector_store %arg7[%c0_28, %c0_29], %38 {strides = array<i32>} : memref<8x1xf32, #tpu.memory_space<vmem>>, vector<8x1xf32>,
      %cst_30 = arith.constant 0.000000e+00 : f32
      %40 = vector.broadcast %cst_30 : f32 to vector<8x1xf32>
      %c0_31 = arith.constant 0 : index
      %c0_32 = arith.constant 0 : index
      %41 = vector.load %arg8[%c0_31, %c0_32] : memref<8x1xf32, #tpu.memory_space<vmem>>, vector<8x1xf32>
      tpu.vector_store %arg8[%c0_31, %c0_32], %40 {strides = array<i32>} : memref<8x1xf32, #tpu.memory_space<vmem>>, vector<8x1xf32>,
      %cst_33 = arith.constant 0.000000e+00 : f32
      %42 = vector.broadcast %cst_33 : f32 to vector<8x8xf32>
      %c0_34 = arith.constant 0 : index
      %c0_35 = arith.constant 0 : index
      %43 = vector.load %arg9[%c0_34, %c0_35] : memref<8x8xf32, #tpu.memory_space<vmem>>, vector<8x8xf32>
      tpu.vector_store %arg9[%c0_34, %c0_35], %42 {strides = array<i32>} : memref<8x8xf32, #tpu.memory_space<vmem>>, vector<8x8xf32>,
    } else {
    }
    %c0 = arith.constant 0 : index
    %c0_1 = arith.constant 0 : index
    %c0_2 = arith.constant 0 : index
    %3 = vector.load %arg3[%c0, %c0_1, %c0_2] : memref<1x8x8xbf16, #tpu.memory_space<vmem>>, vector<1x8x8xbf16>
    %4 = vector.shape_cast %3 : vector<1x8x8xbf16> to vector<8x8xbf16>
    %c0_3 = arith.constant 0 : index
    %c0_4 = arith.constant 0 : index
    %c0_5 = arith.constant 0 : index
    %5 = vector.load %arg4[%c0_3, %c0_4, %c0_5] : memref<1x8x8xbf16, #tpu.memory_space<vmem>>, vector<1x8x8xbf16>
    %6 = vector.shape_cast %5 : vector<1x8x8xbf16> to vector<8x8xbf16>
    %c0_6 = arith.constant 0 : index
    %c0_7 = arith.constant 0 : index
    %c0_8 = arith.constant 0 : index
    %7 = vector.load %arg5[%c0_6, %c0_7, %c0_8] : memref<1x8x8xbf16, #tpu.memory_space<vmem>>, vector<1x8x8xbf16>
    %8 = vector.shape_cast %7 : vector<1x8x8xbf16> to vector<8x8xbf16>
    %cst = arith.constant dense<0.000000e+00> : vector<8x8xf32>
    %9 = tpu.matmul %4, %6, %cst {dimension_numbers = #tpu.dot_dimension_numbers<[1], [1], [0], [0], [0, 0, 1, 0], [], []>} : vector<8x8xbf16>, vector<8x8xbf16>, vector<8x8xf32> -> vector<8x8xf32>
    %cst_9 = arith.constant 0.353553385 : f32
    %10 = vector.broadcast %cst_9 : f32 to vector<8x8xf32>
    %11 = arith.mulf %9, %10 : vector<8x8xf32>
    %c0_10 = arith.constant 0 : index
    %c0_11 = arith.constant 0 : index
    %12 = vector.load %arg7[%c0_10, %c0_11] : memref<8x1xf32, #tpu.memory_space<vmem>>, vector<8x1xf32>
    %cst_12 = arith.constant dense<0xFF800000> : vector<8xf32>
    %13 = vector.multi_reduction <maximumf>, %11, %cst_12 [1] : vector<8x8xf32> to vector<8xf32>
    %14 = vector.shape_cast %13 : vector<8xf32> to vector<8x1xf32>
    %15 = arith.maximumf %12, %14 : vector<8x1xf32>
    %16 = arith.subf %12, %15 : vector<8x1xf32>
    %17 = math.exp %16 : vector<8x1xf32>
    %18 = vector.broadcast %15 : vector<8x1xf32> to vector<8x8xf32>
    %19 = arith.subf %11, %18 : vector<8x8xf32>
    %20 = math.exp %19 : vector<8x8xf32>
    %c0_13 = arith.constant 0 : index
    %c0_14 = arith.constant 0 : index
    %21 = vector.load %arg8[%c0_13, %c0_14] : memref<8x1xf32, #tpu.memory_space<vmem>>, vector<8x1xf32>
    %22 = arith.mulf %17, %21 : vector<8x1xf32>
    %cst_15 = arith.constant dense<0.000000e+00> : vector<8xf32>
    %23 = vector.multi_reduction <add>, %20, %cst_15 [1] : vector<8x8xf32> to vector<8xf32>
    %24 = vector.shape_cast %23 : vector<8xf32> to vector<8x1xf32>
    %25 = arith.addf %22, %24 : vector<8x1xf32>
    %c0_16 = arith.constant 0 : index
    %c0_17 = arith.constant 0 : index
    %26 = vector.load %arg8[%c0_16, %c0_17] : memref<8x1xf32, #tpu.memory_space<vmem>>, vector<8x1xf32>
    tpu.vector_store %arg8[%c0_16, %c0_17], %25 {strides = array<i32>} : memref<8x1xf32, #tpu.memory_space<vmem>>, vector<8x1xf32>,
    %c0_18 = arith.constant 0 : index
    %c0_19 = arith.constant 0 : index
    %27 = vector.load %arg9[%c0_18, %c0_19] : memref<8x8xf32, #tpu.memory_space<vmem>>, vector<8x8xf32>
    %28 = vector.broadcast %17 : vector<8x1xf32> to vector<8x8xf32>
    %29 = arith.mulf %28, %27 : vector<8x8xf32>
    %30 = arith.truncf %20 : vector<8x8xf32> to vector<8x8xbf16>
    %cst_20 = arith.constant dense<0.000000e+00> : vector<8x8xf32>
    %31 = tpu.matmul %30, %8, %cst_20 {dimension_numbers = #tpu.dot_dimension_numbers<[1], [0], [0], [1], [0, 0, 1, 1], [], []>} : vector<8x8xbf16>, vector<8x8xbf16>, vector<8x8xf32> -> vector<8x8xf32>
    %32 = arith.addf %29, %31 : vector<8x8xf32>
    %c0_21 = arith.constant 0 : index
    %c0_22 = arith.constant 0 : index
    %33 = vector.load %arg9[%c0_21, %c0_22] : memref<8x8xf32, #tpu.memory_space<vmem>>, vector<8x8xf32>
    tpu.vector_store %arg9[%c0_21, %c0_22], %32 {strides = array<i32>} : memref<8x8xf32, #tpu.memory_space<vmem>>, vector<8x8xf32>,
    %c0_23 = arith.constant 0 : index
    %c0_24 = arith.constant 0 : index
    %34 = vector.load %arg7[%c0_23, %c0_24] : memref<8x1xf32, #tpu.memory_space<vmem>>, vector<8x1xf32>
    tpu.vector_store %arg7[%c0_23, %c0_24], %15 {strides = array<i32>} : memref<8x1xf32, #tpu.memory_space<vmem>>, vector<8x1xf32>,
    %c0_i32_25 = arith.constant 0 : i32
    %35 = arith.cmpi eq, %arg2, %c0_i32_25 : i32
    %36 = arith.extui %35 : i1 to i32
    %c0_i32_26 = arith.constant 0 : i32
    %37 = arith.cmpi ne, %36, %c0_i32_26 : i32
    scf.if %37 {
      %c0_27 = arith.constant 0 : index
      %c0_28 = arith.constant 0 : index
      %38 = vector.load %arg9[%c0_27, %c0_28] : memref<8x8xf32, #tpu.memory_space<vmem>>, vector<8x8xf32>
      %c0_29 = arith.constant 0 : index
      %c0_30 = arith.constant 0 : index
      %39 = vector.load %arg8[%c0_29, %c0_30] : memref<8x1xf32, #tpu.memory_space<vmem>>, vector<8x1xf32>
      %40 = tpu.reciprocal %39 {approx = true} : vector<8x1xf32> -> vector<8x1xf32>
      %41 = vector.broadcast %40 : vector<8x1xf32> to vector<8x8xf32>
      %42 = arith.mulf %38, %41 : vector<8x8xf32>
      %43 = arith.truncf %42 : vector<8x8xf32> to vector<8x8xbf16>
      %c0_31 = arith.constant 0 : index
      %c0_32 = arith.constant 0 : index
      %c0_33 = arith.constant 0 : index
      %44 = vector.load %arg6[%c0_31, %c0_32, %c0_33] : memref<1x8x8xbf16, #tpu.memory_space<vmem>>, vector<1x8x8xbf16>
      %45 = vector.shape_cast %44 : vector<1x8x8xbf16> to vector<8x8xbf16>
      %46 = vector.shape_cast %43 : vector<8x8xbf16> to vector<1x8x8xbf16>
      tpu.vector_store %arg6[%c0_31, %c0_32, %c0_33], %46 {strides = array<i32>} : memref<1x8x8xbf16, #tpu.memory_space<vmem>>, vector<1x8x8xbf16>,
    } else {
    }
    return
  }
  func.func @transform_0(%arg0: i32, %arg1: i32, %arg2: i32) -> (i32, i32, i32) {
    %c4_i32 = arith.constant 4 : i32
    %0 = arith.muli %arg0, %c4_i32 : i32
    %c0_i32 = arith.constant 0 : i32
    %1 = arith.addi %c0_i32, %0 : i32
    %2 = arith.addi %1, %arg1 : i32
    %c0_i32_0 = arith.constant 0 : i32
    %c0_i32_1 = arith.constant 0 : i32
    %c0_i32_2 = arith.constant 0 : i32
    return %2, %c0_i32_0, %c0_i32_1 : i32, i32, i32
  }
  func.func @transform_1(%arg0: i32, %arg1: i32, %arg2: i32) -> (i32, i32, i32) {
    %c4_i32 = arith.constant 4 : i32
    %0 = arith.muli %arg0, %c4_i32 : i32
    %c0_i32 = arith.constant 0 : i32
    %1 = arith.addi %c0_i32, %0 : i32
    %2 = arith.addi %1, %arg1 : i32
    %c0_i32_0 = arith.constant 0 : i32
    %c0_i32_1 = arith.constant 0 : i32
    return %2, %arg2, %c0_i32_0 : i32, i32, i32
  }
  func.func @transform_2(%arg0: i32, %arg1: i32, %arg2: i32) -> (i32, i32, i32) {
    %c4_i32 = arith.constant 4 : i32
    %0 = arith.muli %arg0, %c4_i32 : i32
    %c8_i32 = arith.constant 8 : i32
    %1 = arith.addi %c8_i32, %0 : i32
    %2 = arith.addi %1, %arg1 : i32
    %c0_i32 = arith.constant 0 : i32
    %c0_i32_0 = arith.constant 0 : i32
    return %2, %arg2, %c0_i32 : i32, i32, i32
  }
  func.func @transform_3(%arg0: i32, %arg1: i32, %arg2: i32) -> (i32, i32, i32) {
    %c4_i32 = arith.constant 4 : i32
    %0 = arith.muli %arg0, %c4_i32 : i32
    %1 = arith.addi %0, %arg1 : i32
    %c0_i32 = arith.constant 0 : i32
    %c0_i32_0 = arith.constant 0 : i32
    %c0_i32_1 = arith.constant 0 : i32
    return %1, %c0_i32, %c0_i32_0 : i32, i32, i32
  }
}

module attributes {stable_mosaic.version = 11 : i64} {
  func.func @_ffn_res_ln_kernel(%arg0: i32, %arg1: i32, %arg2: memref<16x32xbf16, #tpu.memory_space<vmem>>, %arg3: memref<32x64xbf16, #tpu.memory_space<vmem>>, %arg4: memref<1x64xf32, #tpu.memory_space<vmem>>, %arg5: memref<64x32xbf16, #tpu.memory_space<vmem>>, %arg6: memref<1x32xf32, #tpu.memory_space<vmem>>, %arg7: memref<1x32xf32, #tpu.memory_space<vmem>>, %arg8: memref<1x32xf32, #tpu.memory_space<vmem>>, %arg9: memref<16x32xbf16, #tpu.memory_space<vmem>>, %arg10: memref<16x32xf32, #tpu.memory_space<vmem>>) attributes {dimension_semantics = [#tpu.dimension_semantics<parallel>, #tpu.dimension_semantics<arbitrary>], iteration_bounds = array<i64: 1, 1>, scalar_prefetch = 0 : i64, scratch_operands = 1 : i64, tpu.core_type = #tpu.core_type<tc>, window_params = [{transform_indices = @transform_0, window_bounds = array<i64: 16, 32>}, {transform_indices = @transform_1, window_bounds = array<i64: 32, 64>}, {transform_indices = @transform_2, window_bounds = array<i64: 1, 64>}, {transform_indices = @transform_3, window_bounds = array<i64: 64, 32>}, {pipeline_mode = #tpu.pipeline_mode<synchronous>, transform_indices = @transform_4, window_bounds = array<i64: 1, 32>}, {pipeline_mode = #tpu.pipeline_mode<synchronous>, transform_indices = @transform_5, window_bounds = array<i64: 1, 32>}, {pipeline_mode = #tpu.pipeline_mode<synchronous>, transform_indices = @transform_6, window_bounds = array<i64: 1, 32>}, {transform_indices = @transform_7, window_bounds = array<i64: 16, 32>}]} {
    %c0_i32 = arith.constant 0 : i32
    %0 = arith.cmpi eq, %arg1, %c0_i32 : i32
    %1 = arith.extui %0 : i1 to i32
    %c0_i32_0 = arith.constant 0 : i32
    %2 = arith.cmpi ne, %1, %c0_i32_0 : i32
    scf.if %2 {
      %cst_16 = arith.constant 0.000000e+00 : f32
      %20 = vector.broadcast %cst_16 : f32 to vector<16x32xf32>
      %c0_17 = arith.constant 0 : index
      %c0_18 = arith.constant 0 : index
      %21 = vector.load %arg10[%c0_17, %c0_18] : memref<16x32xf32, #tpu.memory_space<vmem>>, vector<16x32xf32>
      tpu.vector_store %arg10[%c0_17, %c0_18], %20 {strides = array<i32>} : memref<16x32xf32, #tpu.memory_space<vmem>>, vector<16x32xf32>,
    } else {
    }
    %c0 = arith.constant 0 : index
    %c0_1 = arith.constant 0 : index
    %3 = vector.load %arg2[%c0, %c0_1] : memref<16x32xbf16, #tpu.memory_space<vmem>>, vector<16x32xbf16>
    %c0_2 = arith.constant 0 : index
    %c0_3 = arith.constant 0 : index
    %4 = vector.load %arg3[%c0_2, %c0_3] : memref<32x64xbf16, #tpu.memory_space<vmem>>, vector<32x64xbf16>
    %cst = arith.constant dense<0.000000e+00> : vector<16x64xf32>
    %5 = tpu.matmul %3, %4, %cst {dimension_numbers = #tpu.dot_dimension_numbers<[1], [0], [0], [1], [0, 0, 1, 1], [], []>} : vector<16x32xbf16>, vector<32x64xbf16>, vector<16x64xf32> -> vector<16x64xf32>
    %c0_4 = arith.constant 0 : index
    %c0_5 = arith.constant 0 : index
    %6 = vector.load %arg4[%c0_4, %c0_5] : memref<1x64xf32, #tpu.memory_space<vmem>>, vector<1x64xf32>
    %7 = vector.broadcast %6 : vector<1x64xf32> to vector<16x64xf32>
    %8 = arith.addf %5, %7 : vector<16x64xf32>
    %cst_6 = arith.constant 0.000000e+00 : f32
    %9 = vector.broadcast %cst_6 : f32 to vector<16x64xf32>
    %10 = arith.maximumf %8, %9 : vector<16x64xf32>
    %11 = arith.truncf %10 : vector<16x64xf32> to vector<16x64xbf16>
    %c0_7 = arith.constant 0 : index
    %c0_8 = arith.constant 0 : index
    %12 = vector.load %arg10[%c0_7, %c0_8] : memref<16x32xf32, #tpu.memory_space<vmem>>, vector<16x32xf32>
    %c0_9 = arith.constant 0 : index
    %c0_10 = arith.constant 0 : index
    %13 = vector.load %arg5[%c0_9, %c0_10] : memref<64x32xbf16, #tpu.memory_space<vmem>>, vector<64x32xbf16>
    %cst_11 = arith.constant dense<0.000000e+00> : vector<16x32xf32>
    %14 = tpu.matmul %11, %13, %cst_11 {dimension_numbers = #tpu.dot_dimension_numbers<[1], [0], [0], [1], [0, 0, 1, 1], [], []>} : vector<16x64xbf16>, vector<64x32xbf16>, vector<16x32xf32> -> vector<16x32xf32>
    %15 = arith.addf %12, %14 : vector<16x32xf32>
    %c0_12 = arith.constant 0 : index
    %c0_13 = arith.constant 0 : index
    %16 = vector.load %arg10[%c0_12, %c0_13] : memref<16x32xf32, #tpu.memory_space<vmem>>, vector<16x32xf32>
    tpu.vector_store %arg10[%c0_12, %c0_13], %15 {strides = array<i32>} : memref<16x32xf32, #tpu.memory_space<vmem>>, vector<16x32xf32>,
    %c0_i32_14 = arith.constant 0 : i32
    %17 = arith.cmpi eq, %arg1, %c0_i32_14 : i32
    %18 = arith.extui %17 : i1 to i32
    %c0_i32_15 = arith.constant 0 : i32
    %19 = arith.cmpi ne, %18, %c0_i32_15 : i32
    scf.if %19 {
      %c0_16 = arith.constant 0 : index
      %c0_17 = arith.constant 0 : index
      %20 = vector.load %arg10[%c0_16, %c0_17] : memref<16x32xf32, #tpu.memory_space<vmem>>, vector<16x32xf32>
      %c0_18 = arith.constant 0 : index
      %c0_19 = arith.constant 0 : index
      %21 = vector.load %arg6[%c0_18, %c0_19] : memref<1x32xf32, #tpu.memory_space<vmem>>, vector<1x32xf32>
      %22 = vector.broadcast %21 : vector<1x32xf32> to vector<16x32xf32>
      %23 = arith.addf %20, %22 : vector<16x32xf32>
      %c0_20 = arith.constant 0 : index
      %c0_21 = arith.constant 0 : index
      %24 = vector.load %arg2[%c0_20, %c0_21] : memref<16x32xbf16, #tpu.memory_space<vmem>>, vector<16x32xbf16>
      %25 = arith.extf %24 : vector<16x32xbf16> to vector<16x32xf32>
      %26 = arith.addf %23, %25 : vector<16x32xf32>
      %cst_22 = arith.constant dense<0.000000e+00> : vector<16xf32>
      %27 = vector.multi_reduction <add>, %26, %cst_22 [1] : vector<16x32xf32> to vector<16xf32>
      %28 = vector.shape_cast %27 : vector<16xf32> to vector<16x1xf32>
      %cst_23 = arith.constant 3.200000e+01 : f32
      %29 = vector.broadcast %cst_23 : f32 to vector<16x1xf32>
      %30 = arith.divf %28, %29 : vector<16x1xf32>
      %31 = vector.broadcast %30 : vector<16x1xf32> to vector<16x32xf32>
      %32 = arith.subf %26, %31 : vector<16x32xf32>
      %33 = arith.mulf %32, %32 : vector<16x32xf32>
      %cst_24 = arith.constant dense<0.000000e+00> : vector<16xf32>
      %34 = vector.multi_reduction <add>, %33, %cst_24 [1] : vector<16x32xf32> to vector<16xf32>
      %35 = vector.shape_cast %34 : vector<16xf32> to vector<16x1xf32>
      %cst_25 = arith.constant 3.200000e+01 : f32
      %36 = vector.broadcast %cst_25 : f32 to vector<16x1xf32>
      %37 = arith.divf %35, %36 : vector<16x1xf32>
      %38 = vector.broadcast %30 : vector<16x1xf32> to vector<16x32xf32>
      %39 = arith.subf %26, %38 : vector<16x32xf32>
      %cst_26 = arith.constant 9.99999974E-6 : f32
      %40 = vector.broadcast %cst_26 : f32 to vector<16x1xf32>
      %41 = arith.addf %37, %40 : vector<16x1xf32>
      %42 = math.rsqrt %41 : vector<16x1xf32>
      %43 = vector.broadcast %42 : vector<16x1xf32> to vector<16x32xf32>
      %44 = arith.mulf %39, %43 : vector<16x32xf32>
      %c0_27 = arith.constant 0 : index
      %c0_28 = arith.constant 0 : index
      %45 = vector.load %arg7[%c0_27, %c0_28] : memref<1x32xf32, #tpu.memory_space<vmem>>, vector<1x32xf32>
      %46 = vector.broadcast %45 : vector<1x32xf32> to vector<16x32xf32>
      %47 = arith.mulf %44, %46 : vector<16x32xf32>
      %c0_29 = arith.constant 0 : index
      %c0_30 = arith.constant 0 : index
      %48 = vector.load %arg8[%c0_29, %c0_30] : memref<1x32xf32, #tpu.memory_space<vmem>>, vector<1x32xf32>
      %49 = vector.broadcast %48 : vector<1x32xf32> to vector<16x32xf32>
      %50 = arith.addf %47, %49 : vector<16x32xf32>
      %51 = arith.truncf %50 : vector<16x32xf32> to vector<16x32xbf16>
      %c0_31 = arith.constant 0 : index
      %c0_32 = arith.constant 0 : index
      %52 = vector.load %arg9[%c0_31, %c0_32] : memref<16x32xbf16, #tpu.memory_space<vmem>>, vector<16x32xbf16>
      tpu.vector_store %arg9[%c0_31, %c0_32], %51 {strides = array<i32>} : memref<16x32xbf16, #tpu.memory_space<vmem>>, vector<16x32xbf16>,
    } else {
    }
    return
  }
  func.func @transform_0(%arg0: i32, %arg1: i32) -> (i32, i32) {
    %c0_i32 = arith.constant 0 : i32
    %c0_i32_0 = arith.constant 0 : i32
    return %arg0, %c0_i32 : i32, i32
  }
  func.func @transform_1(%arg0: i32, %arg1: i32) -> (i32, i32) {
    %c0_i32 = arith.constant 0 : i32
    %c0_i32_0 = arith.constant 0 : i32
    return %c0_i32, %arg1 : i32, i32
  }
  func.func @transform_2(%arg0: i32, %arg1: i32) -> (i32, i32) {
    %c0_i32 = arith.constant 0 : i32
    %c0_i32_0 = arith.constant 0 : i32
    return %c0_i32, %arg1 : i32, i32
  }
  func.func @transform_3(%arg0: i32, %arg1: i32) -> (i32, i32) {
    %c0_i32 = arith.constant 0 : i32
    %c0_i32_0 = arith.constant 0 : i32
    return %arg1, %c0_i32 : i32, i32
  }
  func.func @transform_4(%arg0: i32, %arg1: i32) -> (i32, i32) {
    %c0_i32 = arith.constant 0 : i32
    %c0_i32_0 = arith.constant 0 : i32
    %c0_i32_1 = arith.constant 0 : i32
    return %c0_i32, %c0_i32_0 : i32, i32
  }
  func.func @transform_5(%arg0: i32, %arg1: i32) -> (i32, i32) {
    %c0_i32 = arith.constant 0 : i32
    %c0_i32_0 = arith.constant 0 : i32
    %c0_i32_1 = arith.constant 0 : i32
    return %c0_i32, %c0_i32_0 : i32, i32
  }
  func.func @transform_6(%arg0: i32, %arg1: i32) -> (i32, i32) {
    %c0_i32 = arith.constant 0 : i32
    %c0_i32_0 = arith.constant 0 : i32
    %c0_i32_1 = arith.constant 0 : i32
    return %c0_i32, %c0_i32_0 : i32, i32
  }
  func.func @transform_7(%arg0: i32, %arg1: i32) -> (i32, i32) {
    %c0_i32 = arith.constant 0 : i32
    %c0_i32_0 = arith.constant 0 : i32
    return %arg0, %c0_i32 : i32, i32
  }
}

module attributes {stable_mosaic.version = 11 : i64} {
  func.func @_ln_kernel(%arg0: i32, %arg1: memref<16x32xbf16, #tpu.memory_space<vmem>>, %arg2: memref<1x32xf32, #tpu.memory_space<vmem>>, %arg3: memref<1x32xf32, #tpu.memory_space<vmem>>, %arg4: memref<16x32xf32, #tpu.memory_space<vmem>>) attributes {dimension_semantics = [#tpu.dimension_semantics<parallel>], iteration_bounds = array<i64: 1>, scalar_prefetch = 0 : i64, scratch_operands = 0 : i64, tpu.core_type = #tpu.core_type<tc>, window_params = [{transform_indices = @transform_0, window_bounds = array<i64: 16, 32>}, {pipeline_mode = #tpu.pipeline_mode<synchronous>, transform_indices = @transform_1, window_bounds = array<i64: 1, 32>}, {pipeline_mode = #tpu.pipeline_mode<synchronous>, transform_indices = @transform_2, window_bounds = array<i64: 1, 32>}, {transform_indices = @transform_3, window_bounds = array<i64: 16, 32>}]} {
    %c0 = arith.constant 0 : index
    %c0_0 = arith.constant 0 : index
    %0 = vector.load %arg1[%c0, %c0_0] : memref<16x32xbf16, #tpu.memory_space<vmem>>, vector<16x32xbf16>
    %1 = arith.extf %0 : vector<16x32xbf16> to vector<16x32xf32>
    %cst = arith.constant dense<0.000000e+00> : vector<16xf32>
    %2 = vector.multi_reduction <add>, %1, %cst [1] : vector<16x32xf32> to vector<16xf32>
    %3 = vector.shape_cast %2 : vector<16xf32> to vector<16x1xf32>
    %cst_1 = arith.constant 3.200000e+01 : f32
    %4 = vector.broadcast %cst_1 : f32 to vector<16x1xf32>
    %5 = arith.divf %3, %4 : vector<16x1xf32>
    %6 = vector.broadcast %5 : vector<16x1xf32> to vector<16x32xf32>
    %7 = arith.subf %1, %6 : vector<16x32xf32>
    %8 = arith.mulf %7, %7 : vector<16x32xf32>
    %cst_2 = arith.constant dense<0.000000e+00> : vector<16xf32>
    %9 = vector.multi_reduction <add>, %8, %cst_2 [1] : vector<16x32xf32> to vector<16xf32>
    %10 = vector.shape_cast %9 : vector<16xf32> to vector<16x1xf32>
    %cst_3 = arith.constant 3.200000e+01 : f32
    %11 = vector.broadcast %cst_3 : f32 to vector<16x1xf32>
    %12 = arith.divf %10, %11 : vector<16x1xf32>
    %13 = vector.broadcast %5 : vector<16x1xf32> to vector<16x32xf32>
    %14 = arith.subf %1, %13 : vector<16x32xf32>
    %cst_4 = arith.constant 9.99999974E-6 : f32
    %15 = vector.broadcast %cst_4 : f32 to vector<16x1xf32>
    %16 = arith.addf %12, %15 : vector<16x1xf32>
    %17 = math.rsqrt %16 : vector<16x1xf32>
    %18 = vector.broadcast %17 : vector<16x1xf32> to vector<16x32xf32>
    %19 = arith.mulf %14, %18 : vector<16x32xf32>
    %c0_5 = arith.constant 0 : index
    %c0_6 = arith.constant 0 : index
    %20 = vector.load %arg2[%c0_5, %c0_6] : memref<1x32xf32, #tpu.memory_space<vmem>>, vector<1x32xf32>
    %21 = vector.broadcast %20 : vector<1x32xf32> to vector<16x32xf32>
    %22 = arith.mulf %19, %21 : vector<16x32xf32>
    %c0_7 = arith.constant 0 : index
    %c0_8 = arith.constant 0 : index
    %23 = vector.load %arg3[%c0_7, %c0_8] : memref<1x32xf32, #tpu.memory_space<vmem>>, vector<1x32xf32>
    %24 = vector.broadcast %23 : vector<1x32xf32> to vector<16x32xf32>
    %25 = arith.addf %22, %24 : vector<16x32xf32>
    %c0_9 = arith.constant 0 : index
    %c0_10 = arith.constant 0 : index
    %26 = vector.load %arg4[%c0_9, %c0_10] : memref<16x32xf32, #tpu.memory_space<vmem>>, vector<16x32xf32>
    tpu.vector_store %arg4[%c0_9, %c0_10], %25 {strides = array<i32>} : memref<16x32xf32, #tpu.memory_space<vmem>>, vector<16x32xf32>,
    return
  }
  func.func @transform_0(%arg0: i32) -> (i32, i32) {
    %c0_i32 = arith.constant 0 : i32
    %c0_i32_0 = arith.constant 0 : i32
    return %arg0, %c0_i32 : i32, i32
  }
  func.func @transform_1(%arg0: i32) -> (i32, i32) {
    %c0_i32 = arith.constant 0 : i32
    %c0_i32_0 = arith.constant 0 : i32
    %c0_i32_1 = arith.constant 0 : i32
    return %c0_i32, %c0_i32_0 : i32, i32
  }
  func.func @transform_2(%arg0: i32) -> (i32, i32) {
    %c0_i32 = arith.constant 0 : i32
    %c0_i32_0 = arith.constant 0 : i32
    %c0_i32_1 = arith.constant 0 : i32
    return %c0_i32, %c0_i32_0 : i32, i32
  }
  func.func @transform_3(%arg0: i32) -> (i32, i32) {
    %c0_i32 = arith.constant 0 : i32
    %c0_i32_0 = arith.constant 0 : i32
    return %arg0, %c0_i32 : i32, i32
  }
}

</mosaic_0001>

<bundles_post_ra>
// kernel: _lambda_.17
= control target key start
LH: loop header
LB: loop body
LE: loop exit
PB: predicated region body
PF: predicated region fallthrough
CT: control target
= control target key end

     0   :  { %vm19_vm0 = vcmask 785408   ;;  %v151_v0 = vmov 0.0   ;;  %vm152_vm1 = vmmov 0   ;;  %vm47_vm2 = vcmask 261120   ;;  %s195_s1 = inlined_call_operand.vmem [shape: bf16[32,96], index: 1, kind: input, shape index: {}]   ;;  %s196_s0 = inlined_call_operand.vmem [shape: bf16[16,32], index: 0, kind: input, shape index: {}]   ;;  %s197_s2 = inlined_call_operand.vmem [shape: f32[1,96], index: 2, kind: input, shape index: {}]   ;;  %s198_s3 = inlined_call_operand.vmem [shape: bf16[16,96], index: 3, kind: output, shape index: {}]  }
   0x1   :  { %138 = vmatprep.subr.bf16.mxu0 %v151_v0  ;;  %v148_v1 = vld [vmem:[%s195_s1] sm:$0xff]   ;;  %142 = vmatprep.mubr.msk.bf16.mxu0 %vm152_vm1, %v151_v0  ;;  %20 = vst.msk [vmem:[#allocation2] sm:$0xff] %vm19_vm0, %v151_v0  ;;  %21 = vst.msk [vmem:[#allocation2 + $0x8] sm:$0xff] %vm19_vm0, %v151_v0  ;;  %v149_v2 = vld [vmem:[%s195_s1 + $0x8] sm:$0xff]   ;;  %vm119_vm3 = vcmask 781312  }
   0x2   :  { %139 = vmatpush3.bf16.msra.mxu0 %v148_v1  ;;  %v150_v3 = vld [vmem:[%s196_s0] sm:$0xff]  }
   0x3   :  { %140 = vmatprep.subr.bf16.mxu0 %v151_v0  ;;  %v130_v12 = vld [vmem:[%s197_s2] ss:$0 sm:$0xff] }
   0x6   :  { %141 = vmatpush3.bf16.msra.mxu0 %v149_v2 }
   0x8   :  { %v22_v4 = vld [vmem:[#allocation2] sm:$0xff]  ;;  %v23_v6 = vld [vmem:[#allocation2 + $0x8] sm:$0xff] }
   0x9   :  { %143 = vmatmul.mubr.msk.bf16.vlgmr.msra.gmra.mrb[0].mxu0 %vm47_vm2, %v150_v3 }
  0xdc   :  { %v85_v5 = vpop.f32.mrb[0].mxu0 }
  0xdd   :  { %v92_v7 = vadd.f32 %v85_v5, %v22_v4  ;;  %v144_v8 = vpop.f32.mrb[1].mxu0 }
  0xde   :  { %v88_v9 = vpop.f32.mrb[2].mxu0 }
  0xdf   :  { %95 = vst.msk [vmem:[#allocation2] sm:$0xff] %vm19_vm0, %v92_v7  ;;  %v93_v10 = vadd.f32 %v88_v9, %v23_v6  ;;  %v145_v11 = vpop.f32.mrb[3].mxu0 }
  0xe1   :  { %96 = vst.msk [vmem:[#allocation2 + $0x8] sm:$0xff] %vm19_vm0, %v93_v10 }
  0xe6   :  { %v100_v13 = vld [vmem:[#allocation2] sm:$0xff] }
  0xe7   :  { %v109_v14 = vadd.f32 %v130_v12, %v100_v13 }
  0xe8   :  { %v101_v15 = vld [vmem:[#allocation2 + $0x8] sm:$0xff] }
  0xe9   :  { %v133_v16 = vpack.c.bf16 %v109_v14, %v109_v14  ;;  %v110_v17 = vadd.f32 %v130_v12, %v101_v15 }
  0xeb   :  { %120 = vst.msk [vmem:[%s198_s3] sm:$0xf] %vm119_vm3, %v133_v16  ;;  %v134_v18 = vpack.c.bf16 %v110_v17, %v110_v17 }
  0xed   :  { %121 = vst.msk [vmem:[%s198_s3 + $0x4] sm:$0xf] %vm119_vm3, %v134_v18 }

// kernel: _lambda_.19
= control target key start
LH: loop header
LB: loop body
LE: loop exit
PB: predicated region body
PF: predicated region fallthrough
CT: control target
= control target key end

     0   :  { %vm28_vm0 = vcmask 261120   ;;  %v220_v0 = vmov 0.0   ;;  %vm221_vm1 = vmmov 0   ;;  %vm178_vm2 = vcmask 257024   ;;  %s293_s1 = inlined_call_operand.vmem [shape: bf16[32,32], index: 1, kind: input, shape index: {}]   ;;  %s294_s0 = inlined_call_operand.vmem [shape: bf16[16,32], index: 0, kind: input, shape index: {}]   ;;  %s295_s3 = inlined_call_operand.vmem [shape: bf16[16,32], index: 3, kind: input, shape index: {}]   ;;  %s296_s2 = inlined_call_operand.vmem [shape: f32[1,32], index: 2, kind: input, shape index: {}]   ;;  %s297_s4 = inlined_call_operand.vmem [shape: f32[1,32], index: 4, kind: input, shape index: {}]   ;;  %s298_s5 = inlined_call_operand.vmem [shape: f32[1,32], index: 5, kind: input, shape index: {}]   ;;  %s299_s6 = inlined_call_operand.vmem [shape: bf16[16,32], index: 6, kind: output, shape index: {}]  }
   0x1   :  { %203 = vmatprep.subr.bf16.mxu0 %v220_v0  ;;  %v213_v1 = vld [vmem:[%s293_s1] sm:$0xff]   ;;  %207 = vmatprep.mubr.msk.bf16.mxu0 %vm221_vm1, %v220_v0  ;;  %29 = vst.msk [vmem:[#allocation2] sm:$0xff] %vm28_vm0, %v220_v0  ;;  %30 = vst.msk [vmem:[#allocation2 + $0x8] sm:$0xff] %vm28_vm0, %v220_v0  ;;  %v214_v2 = vld [vmem:[%s293_s1 + $0x8] sm:$0xff]  }
   0x2   :  { %204 = vmatpush3.bf16.msra.mxu0 %v213_v1  ;;  %v215_v3 = vld [vmem:[%s294_s0] sm:$0xff]  }
   0x3   :  { %205 = vmatprep.subr.bf16.mxu0 %v220_v0  ;;  %v197_v12 = vld [vmem:[%s295_s3] sm:$0xff]  }
   0x4   :  { %v189_v13 = vld [vmem:[%s296_s2] ss:$0 sm:$0xff]  ;;  %v198_v14 = vunpack.c.l.bf16 %v197_v12  ;;  %v199_v17 = vunpack.c.h.bf16 %v197_v12 }
   0x5   :  { %v190_v41 = vld [vmem:[%s297_s4] ss:$0 sm:$0xff] }
   0x6   :  { %206 = vmatpush3.bf16.msra.mxu0 %v214_v2  ;;  %v191_v43 = vld [vmem:[%s298_s5] ss:$0 sm:$0xff] }
   0x8   :  { %v31_v4 = vld [vmem:[#allocation2] sm:$0xff]  ;;  %v32_v6 = vld [vmem:[#allocation2 + $0x8] sm:$0xff] }
   0x9   :  { %208 = vmatmul.mubr.msk.bf16.vlgmr.msra.gmra.mrb[0].mxu0 %vm28_vm0, %v215_v3 }
  0xdc   :  { %v94_v5 = vpop.f32.mrb[0].mxu0 }
  0xdd   :  { %v101_v7 = vadd.f32 %v94_v5, %v31_v4  ;;  %v209_v8 = vpop.f32.mrb[1].mxu0 }
  0xde   :  { %v97_v9 = vpop.f32.mrb[2].mxu0 }
  0xdf   :  { %103 = vst.msk [vmem:[#allocation2] sm:$0xff] %vm28_vm0, %v101_v7  ;;  %v102_v10 = vadd.f32 %v97_v9, %v32_v6  ;;  %v210_v11 = vpop.f32.mrb[3].mxu0 }
  0xe1   :  { %104 = vst.msk [vmem:[#allocation2 + $0x8] sm:$0xff] %vm28_vm0, %v102_v10 }
  0xe6   :  { %v108_v15 = vld [vmem:[#allocation2] sm:$0xff] }
  0xe7   :  { %v117_v16 = vadd.f32 %v189_v13, %v108_v15 }
  0xe8   :  { %v109_v18 = vld [vmem:[#allocation2 + $0x8] sm:$0xff] }
  0xe9   :  { %v123_v19 = vadd.f32 %v198_v14, %v117_v16  ;;  %v118_v20 = vadd.f32 %v189_v13, %v109_v18 }
  0xeb   :  { %v125_v21 = vsel %vm28_vm0, %v123_v19, 0.0  ;;  %v124_v22 = vadd.f32 %v199_v17, %v118_v20 }
  0xec   :  { %126 = vadd.xlane.f32.xlu0 %v125_v21 }
  0xed   :  { %v128_v23 = vsel %vm28_vm0, %v124_v22, 0.0 }
  0xf0   :  { %129 = vadd.xlane.f32.xlu0 %v128_v23 }
 0x179   :  { %v127_v24 = vpop.xlane.xlu0 %126 }
 0x17a   :  { %v132_v25 = vmul.f32 0.03125, %v127_v24 }
 0x17c   :  { %v134_v26 = vsub.f32 %v123_v19, %v132_v25 }
 0x17d   :  { %v130_v27 = vpop.xlane.xlu0 %129 }
 0x17e   :  { %v133_v28 = vmul.f32 0.03125, %v130_v27  ;;  %v136_v29 = vmul.f32 %v134_v26, %v134_v26 }
 0x180   :  { %v135_v30 = vsub.f32 %v124_v22, %v133_v28  ;;  %v138_v31 = vsel %vm28_vm0, %v136_v29, 0.0 }
 0x181   :  { %139 = vadd.xlane.f32.xlu1 %v138_v31 }
 0x182   :  { %v137_v32 = vmul.f32 %v135_v30, %v135_v30 }
 0x184   :  { %v141_v33 = vsel %vm28_vm0, %v137_v32, 0.0 }
 0x185   :  { %142 = vadd.xlane.f32.xlu1 %v141_v33 }
 0x20e   :  { %v140_v34 = vpop.xlane.xlu1 %139 }
 0x20f   :  { %v144_v35 = vmul.f32 0.03125, %v140_v34 }
 0x211   :  { %v146_v36 = vadd.f32 1e-05, %v144_v35 }
 0x212   :  { %v143_v37 = vpop.xlane.xlu1 %142 }
 0x213   :  { %216 = vrsqrt.f32 %v146_v36  ;;  %v145_v38 = vmul.f32 0.03125, %v143_v37 }
 0x215   :  { %v147_v39 = vadd.f32 1e-05, %v145_v38 }
 0x217   :  { %218 = vrsqrt.f32 %v147_v39 }
 0x21d   :  { %v217_v40 = vpop.eup %216 }
 0x21e   :  { %v150_v42 = vmul.f32 %v217_v40, %v134_v26 }
 0x220   :  { %v159_v44 = vmul.f32 %v190_v41, %v150_v42 }
 0x221   :  { %v219_v45 = vpop.eup %218 }
 0x222   :  { %v168_v46 = vadd.f32 %v191_v43, %v159_v44  ;;  %v151_v47 = vmul.f32 %v219_v45, %v135_v30 }
 0x224   :  { %v194_v48 = vpack.c.bf16 %v168_v46, %v168_v46  ;;  %v160_v49 = vmul.f32 %v190_v41, %v151_v47 }
 0x226   :  { %179 = vst.msk [vmem:[%s299_s6] sm:$0xf] %vm178_vm2, %v194_v48  ;;  %v169_v50 = vadd.f32 %v191_v43, %v160_v49 }
 0x228   :  { %v195_v51 = vpack.c.bf16 %v169_v50, %v169_v50 }
 0x22a   :  { %180 = vst.msk [vmem:[%s299_s6 + $0x4] sm:$0xf] %vm178_vm2, %v195_v51 }

// kernel: _lambda_.18
= control target key start
LH: loop header
LB: loop body
LE: loop exit
PB: predicated region body
PF: predicated region fallthrough
CT: control target
= control target key end

     0   :  { %s735_s12 = smov 0   ;;  %s737_s13 = smov 0   ;;  %s819_s0 = inlined_call_operand.vmem [shape: bf16[24,8,8], index: 0, kind: input, shape index: {}, may-alias: {0,1,2}]   ;;  %s820_s1 = inlined_call_operand.vmem [shape: bf16[24,8,8], index: 1, kind: input, shape index: {}, may-alias: {0,1,2}]   ;;  %s821_s2 = inlined_call_operand.vmem [shape: bf16[24,8,8], index: 2, kind: input, shape index: {}, may-alias: {0,1,2}]   ;;  %s822_s3 = inlined_call_operand.vmem [shape: bf16[8,8,8], index: 3, kind: output, shape index: {}]  }
   0x1   :  { %s739_s14 = smov 0   ;;  %s741_s15 = smov 0  }
   0x2   :  { %s743_s16 = smov 0  }
   0x3 LB: > { %s28_s17 = sadd.s32 1, %s701_s14  ;;  %s32_s18 = sadd.s32 1, %s705_s15  ;;  %s709_s16 = sphi %s743_s16, %s13_s16   ;;  %s705_s15 = sphi %s741_s15, %s826_s15   ;;  %s701_s14 = sphi %s739_s14, %s825_s14   ;;  %s697_s13 = sphi %s737_s13, %s824_s13   ;;  %s693_s12 = sphi %s735_s12, %s823_s12  }
   0x4   : > { %p30_p0 = scmp.ge.s32.totalorder %s28_s17, 4  ;;  %p590_p1 = scmp.ge.s32.totalorder %s709_s16, 1 }
   0x5   : > { %p219_p2 = scmp.lt.s32.totalorder %s709_s16, 9 }
   0x6   : > { %s828_s17 = smov (%p30_p0, %s28_s17), 0  ;;  %s830_s18 = smov (!%p30_p0, %s32_s18), %s705_s15 }
   0x7   : > { %p220_p3 = pnand %p590_p1, %p219_p2  ;;  %p34_p4 = scmp.ge.s32.totalorder %s830_s18, 2 }
   0x8   : > { %s767_s19 = sshll.u32 (!%p220_p3), %s697_s13, 2  ;;  %vm315_vm0 = vcmask (!%p220_p3), 64512   ;;  %v711_v0 = vmov (!%p220_p3), 0.0   ;;  %vm712_vm1 = vmmov (!%p220_p3), 0   ;;  %vm312_vm2 = vcmask (!%p220_p3), 7168  }
   0x9   : > { %s832_s18 = smov (%p34_p4, %s830_s18), 0  ;;  %223 = sbr.rel (%p220_p3) target bundleno = 829 (0x33d), region = 32 }
   0xa   : > { %607 = vmatprep.subr.bf16.mxu0 (!%p220_p3), %v711_v0  ;;  %s771_s20 = sadd.s32 (!%p220_p3), %s693_s12, %s767_s19  ;;  %s274_s21 = sadd.s32 (!%p220_p3), 8, %s767_s19  ;;  %316 = vst.msk [vmem:[#allocation4] sm:$0xff] (!%p220_p3), %vm315_vm0, %v711_v0  ;;  %609 = vmatprep.mubr.msk.bf16.mxu0 (!%p220_p3), %vm712_vm1, %v711_v0  ;;  %v713_v4 = vmov (!%p220_p3), -inf   ;;  %v368_v5 = vlaneseq (!%p220_p3)  ;;  %v714_v15 = vmov (!%p220_p3), 0   ;;  %vm412_vm4 = vcmask (!%p220_p3), 1043456  }
   0xb   : > { %s275_s22 = sadd.s32 (!%p220_p3), %s693_s12, %s274_s21  ;;  %p267_p5 = scmp.lt.s32.totalorder (!%p220_p3), %s771_s20, 23  ;;  %613 = vmatprep.subr.bf16.mxu1 (!%p220_p3), %v711_v0  ;;  %615 = vmatprep.mubr.msk.bf16.mxu1 (!%p220_p3), %vm712_vm1, %v711_v0  ;;  %313 = vst.msk [vmem:[#allocation2] sm:$0xff] (!%p220_p3), %vm312_vm2, %v713_v4  ;;  %314 = vst.msk [vmem:[#allocation3] sm:$0xff] (!%p220_p3), %vm312_vm2, %v711_v0  ;;  %vm472_vm5 = vcmask (!%p220_p3), 60416  }
   0xc   : > { %p276_p6 = scmp.lt.s32.totalorder (!%p220_p3), %s275_s22, 23  ;;  %v369_v6 = vshrl.u32 (!%p220_p3), %v368_v5, 7  ;;  %v371_v7 = vand.u32 (!%p220_p3), 127, %v368_v5  ;;  %663 = vset.pattern.permute.xlu0 (!%p220_p3), %v714_v15  ;;  %664 = vset.pattern.permute.xlu1 (!%p220_p3), %v714_v15  ;;  %s287_s5 = sadd.s32 (!%p220_p3), 16, %s767_s19 }
   0xd   : > { %s288_s6 = sadd.s32 (!%p220_p3), %s693_s12, %s287_s5  ;;  %p301_p8 = scmp.lt.s32.totalorder (!%p220_p3), %s771_s20, 7 }
   0xe   : > { %vm375_vm3 = vcmp.ge.s32.totalorder (!%p220_p3), %v369_v6, %v371_v7  ;;  %p289_p7 = scmp.lt.s32.totalorder (!%p220_p3), %s288_s6, 23 }
  0x10   : > { %s268_s23 = scalar_select %p267_p5, %s771_s20, 23 }
  0x11   : > { %s834_s22 = smov (!%p276_p6, %s275_s22), 23  ;;  %s836_s6 = smov (!%p289_p7, %s288_s6), 23  ;;  %v401_v36 = vld [vmem:[#allocation4] sm:$0xff] }
  0x12   : > { %s594_s24 = sshll.u32 %s834_s22, 2  ;;  %s592_s28 = sshll.u32 %s268_s23, 2  ;;  %v377_v16 = vld [vmem:[#allocation2] sm:$0xff]  ;;  %v393_v30 = vld [vmem:[#allocation3] sm:$0xff] }
  0x13   : > { %s282_s27 = scalar_lea.vmem %s820_s1, %s594_s24  ;;  %s270_s4 = scalar_lea.vmem %s819_s0, %s592_s28 }
  0x14   : > { %v318_v1 = vld [vmem:[%s282_s27] sm:$0xf]  ;;  %s596_s7 = sshll.u32 %s836_s6, 2  ;;  %s838_s20 = smov (!%p301_p8, %s771_s20), 7 }
  0x15   : > { %v325_v2 = vsel %vm315_vm0, %v318_v1, 0  ;;  %v317_v3 = vld [vmem:[%s270_s4] sm:$0xf]  ;;  %s295_s10 = scalar_lea.vmem %s821_s2, %s596_s7  ;;  %s598_s11 = sshll.u32 %s838_s20, 2 }
  0x16   : > { %608 = vmatpush3.bf16.xpose.msra.mxu0 %v325_v2  ;;  %v319_v20 = vld [vmem:[%s295_s10] sm:$0xf]  ;;  %s304_s19 = scalar_lea.vmem %s822_s3, %s598_s11 }
  0x17   : > { %v414_v21 = vsel %vm412_vm4, %v319_v20, 0 }
  0x18   : > { %614 = vmatpush3.bf16.msra.mxu1 %v414_v21 }
  0x1d   : > { %610 = vmatmul.mubr.msk.bf16.vlgmr.msra.gmra.mrb[0].mxu0 %vm315_vm0, %v317_v3 }
  0xf0   : > { %v361_v8 = vpop.f32.mrb[0].mxu0 }
  0xf1   : > { %v367_v9 = vmul.f32 0.35355338, %v361_v8  ;;  %v611_v10 = vpop.f32.mrb[1].mxu0 }
  0xf2   : > { %v364_v11 = vpop.f32.mrb[2].mxu0 }
  0xf3   : > { %v612_v12 = vpop.f32.mrb[3].mxu0  ;;  %v376_v13 = vsel %vm375_vm3, %v367_v9, -1e+30 }
  0xf4   : > { %v378_v14 = vsel %vm315_vm0, %v376_v13, -inf }
  0xf5   : > { %379 = vmax.xlane.f32.xlu0 %v378_v14 }
 0x182   : > { %v380_v17 = vpop.xlane.xlu0 %379 }
 0x183   : > { %v381_v18 = vmax.f32 %v377_v16, %v380_v17 }
 0x185   : > { %v382_v19 = vsub.f32 %v377_v16, %v381_v18  ;;  %458 = vst.msk [vmem:[#allocation2] sm:$0xff] %vm312_vm2, %v381_v18  ;;  %387 = vperm.xlu0 %663, %v381_v18  }
 0x187   : > { %v383_v28 = vmul.f32 1.442695, %v382_v19 }
 0x204   : > { %v388_v22 = vpop.permute.xlu0 %387 }
 0x205   : > { %v390_v23 = vsub.f32 %v376_v13, %v388_v22 }
 0x207   : > { %v391_v24 = vmul.f32 1.442695, %v390_v23 }
 0x209   : > { %665 = vpow2.f32 %v391_v24 }
 0x20a   : > { %667 = vpow2.f32 %v383_v28 }
 0x213   : > { %v666_v25 = vpop.eup %665 }
 0x214   : > { %v395_v26 = vsel %vm315_vm0, %v666_v25, 0.0  ;;  %v408_v27 = vpack.c.bf16 %v666_v25, %v666_v25  ;;  %v668_v29 = vpop.eup %667 }
 0x215   : > { %396 = vadd.xlane.f32.xlu1 %v395_v26  ;;  %v394_v31 = vmul.f32 %v668_v29, %v393_v30 }
 0x216   : > { %616 = vmatmul.mubr.msk.bf16.vlgmr.msra.gmra.mrb[0].mxu1 %vm315_vm0, %v408_v27 }
 0x226   : > { %404 = vperm.xlu1 %664, %v668_v29  }
 0x2a2   : > { %v397_v32 = vpop.xlane.xlu1 %396 }
 0x2a3   : > { %v398_v33 = vadd.f32 %v397_v32, %v394_v31 }
 0x2a5   : > { %400 = vst.msk [vmem:[#allocation3] sm:$0xff] %vm312_vm2, %v398_v33 }
 0x2a6   : > { %v405_v37 = vpop.permute.xlu1 %404 }
 0x2a7   : > { %v407_v38 = vmul.f32 %v405_v37, %v401_v36 }
 0x2ac   : > { %v463_v34 = vld [vmem:[#allocation3] sm:$0xff] }
 0x2ad   : > { %669 = vrcp.f32 %v463_v34 }
 0x2b7   : > { %v670_v35 = vpop.eup %669 }
 0x2b8   : > { %467 = vperm.xlu1 %664, %v670_v35  }
 0x2e9   : > { %v450_v39 = vpop.f32.mrb[0].mxu1 }
 0x2ea   : > { %v456_v40 = vadd.f32 %v450_v39, %v407_v38  ;;  %v617_v41 = vpop.f32.mrb[1].mxu1 }
 0x2eb   : > { %v453_v42 = vpop.f32.mrb[2].mxu1 }
 0x2ec   : > { %457 = vst.msk [vmem:[#allocation4] sm:$0xff] %vm315_vm0, %v456_v40  ;;  %v618_v43 = vpop.f32.mrb[3].mxu1 }
 0x2f3   : > { %v462_v44 = vld [vmem:[#allocation4] sm:$0xff] }
 0x337   : > { %v468_v45 = vpop.permute.xlu1 %467 }
 0x338   : > { %v470_v46 = vmul.f32 %v468_v45, %v462_v44 }
 0x33a   : > { %v471_v47 = vpack.c.bf16 %v470_v46, %v470_v46 }
 0x33c   : > { %473 = vst.msk [vmem:[%s304_s19] sm:$0xf] %vm472_vm5, %v471_v47 }
 0x33d PF: > { %s13_s16 = sadd.s32 1, %s709_s16   ;;  %s823_s12 = smov %s701_s14 }
 0x33e   : > { %p10_p9 = scmp.ge.s32.totalorder %s13_s16, 10   ;;  %s824_s13 = smov %s705_s15 }
 0x33f   : > { %s825_s14 = smov %s828_s17  ;;  %s826_s15 = smov %s832_s18 }
 0x340   :  { %12 = sbr.rel (!%p10_p9) target bundleno = 3 (0x3), region = 76 }

// kernel: _lambda_.20
= control target key start
LH: loop header
LB: loop body
LE: loop exit
PB: predicated region body
PF: predicated region fallthrough
CT: control target
= control target key end

     0   :  { %vm19_vm0 = vcmask 261120   ;;  %v150_v0 = vmov 0.0   ;;  %vm151_vm1 = vmmov 0   ;;  %vm118_vm2 = vcmask 257024   ;;  %s195_s1 = inlined_call_operand.vmem [shape: bf16[32,32], index: 1, kind: input, shape index: {}]   ;;  %s196_s0 = inlined_call_operand.vmem [shape: bf16[16,32], index: 0, kind: input, shape index: {}]   ;;  %s197_s2 = inlined_call_operand.vmem [shape: f32[1,32], index: 2, kind: input, shape index: {}]   ;;  %s198_s3 = inlined_call_operand.vmem [shape: bf16[16,32], index: 3, kind: output, shape index: {}]  }
   0x1   :  { %137 = vmatprep.subr.bf16.mxu0 %v150_v0  ;;  %v147_v1 = vld [vmem:[%s195_s1] sm:$0xff]   ;;  %141 = vmatprep.mubr.msk.bf16.mxu0 %vm151_vm1, %v150_v0  ;;  %20 = vst.msk [vmem:[#allocation2] sm:$0xff] %vm19_vm0, %v150_v0  ;;  %21 = vst.msk [vmem:[#allocation2 + $0x8] sm:$0xff] %vm19_vm0, %v150_v0  ;;  %v148_v2 = vld [vmem:[%s195_s1 + $0x8] sm:$0xff]  }
   0x2   :  { %138 = vmatpush3.bf16.msra.mxu0 %v147_v1  ;;  %v149_v3 = vld [vmem:[%s196_s0] sm:$0xff]  }
   0x3   :  { %139 = vmatprep.subr.bf16.mxu0 %v150_v0  ;;  %v129_v12 = vld [vmem:[%s197_s2] ss:$0 sm:$0xff] }
   0x6   :  { %140 = vmatpush3.bf16.msra.mxu0 %v148_v2 }
   0x8   :  { %v22_v4 = vld [vmem:[#allocation2] sm:$0xff]  ;;  %v23_v6 = vld [vmem:[#allocation2 + $0x8] sm:$0xff] }
   0x9   :  { %142 = vmatmul.mubr.msk.bf16.vlgmr.msra.gmra.mrb[0].mxu0 %vm19_vm0, %v149_v3 }
  0xdc   :  { %v85_v5 = vpop.f32.mrb[0].mxu0 }
  0xdd   :  { %v92_v7 = vadd.f32 %v85_v5, %v22_v4  ;;  %v143_v8 = vpop.f32.mrb[1].mxu0 }
  0xde   :  { %v88_v9 = vpop.f32.mrb[2].mxu0 }
  0xdf   :  { %94 = vst.msk [vmem:[#allocation2] sm:$0xff] %vm19_vm0, %v92_v7  ;;  %v93_v10 = vadd.f32 %v88_v9, %v23_v6  ;;  %v144_v11 = vpop.f32.mrb[3].mxu0 }
  0xe1   :  { %95 = vst.msk [vmem:[#allocation2 + $0x8] sm:$0xff] %vm19_vm0, %v93_v10 }
  0xe6   :  { %v99_v13 = vld [vmem:[#allocation2] sm:$0xff] }
  0xe7   :  { %v108_v14 = vadd.f32 %v129_v12, %v99_v13 }
  0xe8   :  { %v100_v15 = vld [vmem:[#allocation2 + $0x8] sm:$0xff] }
  0xe9   :  { %v132_v16 = vpack.c.bf16 %v108_v14, %v108_v14  ;;  %v109_v17 = vadd.f32 %v129_v12, %v100_v15 }
  0xeb   :  { %119 = vst.msk [vmem:[%s198_s3] sm:$0xf] %vm118_vm2, %v132_v16  ;;  %v133_v18 = vpack.c.bf16 %v109_v17, %v109_v17 }
  0xed   :  { %120 = vst.msk [vmem:[%s198_s3 + $0x4] sm:$0xf] %vm118_vm2, %v133_v18 }

// kernel: _lambda_.21
= control target key start
LH: loop header
LB: loop body
LE: loop exit
PB: predicated region body
PF: predicated region fallthrough
CT: control target
= control target key end

     0   :  { %vm19_vm0 = vcmask 523264   ;;  %v151_v0 = vmov 0.0   ;;  %vm152_vm1 = vmmov 0   ;;  %vm47_vm2 = vcmask 261120   ;;  %s195_s1 = inlined_call_operand.vmem [shape: bf16[32,64], index: 1, kind: input, shape index: {}]   ;;  %s196_s0 = inlined_call_operand.vmem [shape: bf16[16,32], index: 0, kind: input, shape index: {}]   ;;  %s197_s2 = inlined_call_operand.vmem [shape: f32[1,64], index: 2, kind: input, shape index: {}]   ;;  %s198_s3 = inlined_call_operand.vmem [shape: bf16[16,64], index: 3, kind: output, shape index: {}]  }
   0x1   :  { %138 = vmatprep.subr.bf16.mxu0 %v151_v0  ;;  %v148_v1 = vld [vmem:[%s195_s1] sm:$0xff]   ;;  %142 = vmatprep.mubr.msk.bf16.mxu0 %vm152_vm1, %v151_v0  ;;  %20 = vst.msk [vmem:[#allocation2] sm:$0xff] %vm19_vm0, %v151_v0  ;;  %21 = vst.msk [vmem:[#allocation2 + $0x8] sm:$0xff] %vm19_vm0, %v151_v0  ;;  %v149_v2 = vld [vmem:[%s195_s1 + $0x8] sm:$0xff]   ;;  %vm119_vm3 = vcmask 519168  }
   0x2   :  { %139 = vmatpush3.bf16.msra.mxu0 %v148_v1  ;;  %v150_v3 = vld [vmem:[%s196_s0] sm:$0xff]  }
   0x3   :  { %140 = vmatprep.subr.bf16.mxu0 %v151_v0  ;;  %v130_v12 = vld [vmem:[%s197_s2] ss:$0 sm:$0xff] }
   0x6   :  { %141 = vmatpush3.bf16.msra.mxu0 %v149_v2 }
   0x8   :  { %v22_v4 = vld [vmem:[#allocation2] sm:$0xff]  ;;  %v23_v6 = vld [vmem:[#allocation2 + $0x8] sm:$0xff] }
   0x9   :  { %143 = vmatmul.mubr.msk.bf16.vlgmr.msra.gmra.mrb[0].mxu0 %vm47_vm2, %v150_v3 }
  0xdc   :  { %v85_v5 = vpop.f32.mrb[0].mxu0 }
  0xdd   :  { %v92_v7 = vadd.f32 %v85_v5, %v22_v4  ;;  %v144_v8 = vpop.f32.mrb[1].mxu0 }
  0xde   :  { %v88_v9 = vpop.f32.mrb[2].mxu0 }
  0xdf   :  { %95 = vst.msk [vmem:[#allocation2] sm:$0xff] %vm19_vm0, %v92_v7  ;;  %v93_v10 = vadd.f32 %v88_v9, %v23_v6  ;;  %v145_v11 = vpop.f32.mrb[3].mxu0 }
  0xe1   :  { %96 = vst.msk [vmem:[#allocation2 + $0x8] sm:$0xff] %vm19_vm0, %v93_v10 }
  0xe6   :  { %v100_v13 = vld [vmem:[#allocation2] sm:$0xff] }
  0xe7   :  { %v109_v14 = vadd.f32 %v130_v12, %v100_v13 }
  0xe8   :  { %v101_v15 = vld [vmem:[#allocation2 + $0x8] sm:$0xff] }
  0xe9   :  { %v133_v16 = vpack.c.bf16 %v109_v14, %v109_v14  ;;  %v110_v17 = vadd.f32 %v130_v12, %v101_v15 }
  0xeb   :  { %120 = vst.msk [vmem:[%s198_s3] sm:$0xf] %vm119_vm3, %v133_v16  ;;  %v134_v18 = vpack.c.bf16 %v110_v17, %v110_v17 }
  0xed   :  { %121 = vst.msk [vmem:[%s198_s3 + $0x4] sm:$0xf] %vm119_vm3, %v134_v18 }

// kernel: _lambda_.22
= control target key start
LH: loop header
LB: loop body
LE: loop exit
PB: predicated region body
PF: predicated region fallthrough
CT: control target
= control target key end

     0   :  { %s719_s12 = smov 0   ;;  %s721_s13 = smov 0   ;;  %s805_s0 = inlined_call_operand.vmem [shape: bf16[8,8,8], index: 0, kind: input, shape index: {}]   ;;  %s806_s1 = inlined_call_operand.vmem [shape: bf16[16,8,8], index: 1, kind: input, shape index: {}, may-alias: {1,2}]   ;;  %s807_s2 = inlined_call_operand.vmem [shape: bf16[16,8,8], index: 2, kind: input, shape index: {}, may-alias: {1,2}]   ;;  %s808_s3 = inlined_call_operand.vmem [shape: bf16[8,8,8], index: 3, kind: output, shape index: {}]  }
   0x1   :  { %s723_s14 = smov 0   ;;  %s725_s15 = smov 0  }
   0x2   :  { %s727_s16 = smov 0  }
   0x3 LB: > { %s28_s17 = sadd.s32 1, %s685_s14  ;;  %s32_s18 = sadd.s32 1, %s689_s15  ;;  %s693_s16 = sphi %s727_s16, %s13_s16   ;;  %s689_s15 = sphi %s725_s15, %s812_s15   ;;  %s685_s14 = sphi %s723_s14, %s811_s14   ;;  %s681_s13 = sphi %s721_s13, %s810_s13   ;;  %s677_s12 = sphi %s719_s12, %s809_s12  }
   0x4   : > { %p30_p0 = scmp.ge.s32.totalorder %s28_s17, 4  ;;  %p574_p1 = scmp.ge.s32.totalorder %s693_s16, 1 }
   0x5   : > { %p215_p2 = scmp.lt.s32.totalorder %s693_s16, 9 }
   0x6   : > { %s814_s17 = smov (%p30_p0, %s28_s17), 0  ;;  %s816_s18 = smov (!%p30_p0, %s32_s18), %s689_s15 }
   0x7   : > { %p216_p3 = pnand %p574_p1, %p215_p2  ;;  %p34_p4 = scmp.ge.s32.totalorder %s816_s18, 2 }
   0x8   : > { %s575_s19 = sshll.u32 (!%p216_p3), %s681_s13, 2  ;;  %vm308_vm0 = vcmask (!%p216_p3), 64512   ;;  %v695_v0 = vmov (!%p216_p3), 0.0   ;;  %vm696_vm1 = vmmov (!%p216_p3), 0   ;;  %vm305_vm2 = vcmask (!%p216_p3), 7168  }
   0x9   : > { %s818_s18 = smov (%p34_p4, %s816_s18), 0  ;;  %219 = sbr.rel (%p216_p3) target bundleno = 828 (0x33c), region = 32 }
   0xa   : > { %591 = vmatprep.subr.bf16.mxu0 (!%p216_p3), %v695_v0  ;;  %s261_s20 = sadd.s32 (!%p216_p3), %s677_s12, %s575_s19  ;;  %309 = vst.msk [vmem:[#allocation4] sm:$0xff] (!%p216_p3), %vm308_vm0, %v695_v0  ;;  %593 = vmatprep.mubr.msk.bf16.mxu0 (!%p216_p3), %vm696_vm1, %v695_v0  ;;  %v697_v4 = vmov (!%p216_p3), -inf   ;;  %v698_v11 = vmov (!%p216_p3), 0   ;;  %s280_s30 = sadd.s32 (!%p216_p3), 8, %s575_s19  ;;  %vm396_vm3 = vcmask (!%p216_p3), 1043456   ;;  %vm456_vm4 = vcmask (!%p216_p3), 60416  }
   0xb   : > { %p270_p5 = scmp.lt.s32.totalorder (!%p216_p3), %s261_s20, 15  ;;  %p262_p6 = scmp.lt.s32.totalorder (!%p216_p3), %s261_s20, 7  ;;  %597 = vmatprep.subr.bf16.mxu1 (!%p216_p3), %v695_v0  ;;  %599 = vmatprep.mubr.msk.bf16.mxu1 (!%p216_p3), %vm696_vm1, %v695_v0  ;;  %306 = vst.msk [vmem:[#allocation2] sm:$0xff] (!%p216_p3), %vm305_vm2, %v697_v4  ;;  %307 = vst.msk [vmem:[#allocation3] sm:$0xff] (!%p216_p3), %vm305_vm2, %v695_v0 }
   0xc   : > { %647 = vset.pattern.permute.xlu0 (!%p216_p3), %v698_v11  ;;  %648 = vset.pattern.permute.xlu1 (!%p216_p3), %v698_v11  ;;  %s281_s4 = sadd.s32 (!%p216_p3), %s677_s12, %s280_s30 }
   0xd   : > { %p282_p7 = scmp.lt.s32.totalorder (!%p216_p3), %s281_s4, 15 }
  0x10   : > { %s271_s21 = scalar_select %p270_p5, %s261_s20, 15 }
  0x11   : > { %s820_s20 = smov (!%p262_p6, %s261_s20), 7  ;;  %s822_s4 = smov (!%p282_p7, %s281_s4), 15  ;;  %v385_v32 = vld [vmem:[#allocation4] sm:$0xff] }
  0x12   : > { %s578_s22 = sshll.u32 %s271_s21, 2  ;;  %s576_s26 = sshll.u32 %s820_s20, 2  ;;  %v361_v12 = vld [vmem:[#allocation2] sm:$0xff]  ;;  %v377_v26 = vld [vmem:[#allocation3] sm:$0xff] }
  0x13   : > { %s276_s25 = scalar_lea.vmem %s806_s1, %s578_s22  ;;  %s265_s29 = scalar_lea.vmem %s805_s0, %s576_s26 }
  0x14   : > { %v311_v1 = vld [vmem:[%s276_s25] sm:$0xf]  ;;  %s580_s5 = sshll.u32 %s822_s4, 2  ;;  %s297_s11 = scalar_lea.vmem %s808_s3, %s576_s26 }
  0x15   : > { %v318_v2 = vsel %vm308_vm0, %v311_v1, 0  ;;  %v310_v3 = vld [vmem:[%s265_s29] sm:$0xf]  ;;  %s288_s8 = scalar_lea.vmem %s807_s2, %s580_s5 }
  0x16   : > { %592 = vmatpush3.bf16.xpose.msra.mxu0 %v318_v2  ;;  %v312_v16 = vld [vmem:[%s288_s8] sm:$0xf] }
  0x17   : > { %v398_v17 = vsel %vm396_vm3, %v312_v16, 0 }
  0x18   : > { %598 = vmatpush3.bf16.msra.mxu1 %v398_v17 }
  0x1d   : > { %594 = vmatmul.mubr.msk.bf16.vlgmr.msra.gmra.mrb[0].mxu0 %vm308_vm0, %v310_v3 }
  0xf0   : > { %v354_v5 = vpop.f32.mrb[0].mxu0 }
  0xf1   : > { %v360_v6 = vmul.f32 0.35355338, %v354_v5  ;;  %v595_v7 = vpop.f32.mrb[1].mxu0 }
  0xf2   : > { %v357_v8 = vpop.f32.mrb[2].mxu0 }
  0xf3   : > { %v596_v9 = vpop.f32.mrb[3].mxu0  ;;  %v362_v10 = vsel %vm308_vm0, %v360_v6, -inf }
  0xf4   : > { %363 = vmax.xlane.f32.xlu0 %v362_v10 }
 0x181   : > { %v364_v13 = vpop.xlane.xlu0 %363 }
 0x182   : > { %v365_v14 = vmax.f32 %v361_v12, %v364_v13 }
 0x184   : > { %v366_v15 = vsub.f32 %v361_v12, %v365_v14  ;;  %442 = vst.msk [vmem:[#allocation2] sm:$0xff] %vm305_vm2, %v365_v14  ;;  %371 = vperm.xlu0 %647, %v365_v14  }
 0x186   : > { %v367_v24 = vmul.f32 1.442695, %v366_v15 }
 0x203   : > { %v372_v18 = vpop.permute.xlu0 %371 }
 0x204   : > { %v374_v19 = vsub.f32 %v360_v6, %v372_v18 }
 0x206   : > { %v375_v20 = vmul.f32 1.442695, %v374_v19 }
 0x208   : > { %649 = vpow2.f32 %v375_v20 }
 0x209   : > { %651 = vpow2.f32 %v367_v24 }
 0x212   : > { %v650_v21 = vpop.eup %649 }
 0x213   : > { %v379_v22 = vsel %vm308_vm0, %v650_v21, 0.0  ;;  %v392_v23 = vpack.c.bf16 %v650_v21, %v650_v21  ;;  %v652_v25 = vpop.eup %651 }
 0x214   : > { %380 = vadd.xlane.f32.xlu1 %v379_v22  ;;  %v378_v27 = vmul.f32 %v652_v25, %v377_v26 }
 0x215   : > { %600 = vmatmul.mubr.msk.bf16.vlgmr.msra.gmra.mrb[0].mxu1 %vm308_vm0, %v392_v23 }
 0x225   : > { %388 = vperm.xlu1 %648, %v652_v25  }
 0x2a1   : > { %v381_v28 = vpop.xlane.xlu1 %380 }
 0x2a2   : > { %v382_v29 = vadd.f32 %v381_v28, %v378_v27 }
 0x2a4   : > { %384 = vst.msk [vmem:[#allocation3] sm:$0xff] %vm305_vm2, %v382_v29 }
 0x2a5   : > { %v389_v33 = vpop.permute.xlu1 %388 }
 0x2a6   : > { %v391_v34 = vmul.f32 %v389_v33, %v385_v32 }
 0x2ab   : > { %v447_v30 = vld [vmem:[#allocation3] sm:$0xff] }
 0x2ac   : > { %653 = vrcp.f32 %v447_v30 }
 0x2b6   : > { %v654_v31 = vpop.eup %653 }
 0x2b7   : > { %451 = vperm.xlu1 %648, %v654_v31  }
 0x2e8   : > { %v434_v35 = vpop.f32.mrb[0].mxu1 }
 0x2e9   : > { %v440_v36 = vadd.f32 %v434_v35, %v391_v34  ;;  %v601_v37 = vpop.f32.mrb[1].mxu1 }
 0x2ea   : > { %v437_v38 = vpop.f32.mrb[2].mxu1 }
 0x2eb   : > { %441 = vst.msk [vmem:[#allocation4] sm:$0xff] %vm308_vm0, %v440_v36  ;;  %v602_v39 = vpop.f32.mrb[3].mxu1 }
 0x2f2   : > { %v446_v40 = vld [vmem:[#allocation4] sm:$0xff] }
 0x336   : > { %v452_v41 = vpop.permute.xlu1 %451 }
 0x337   : > { %v454_v42 = vmul.f32 %v452_v41, %v446_v40 }
 0x339   : > { %v455_v43 = vpack.c.bf16 %v454_v42, %v454_v42 }
 0x33b   : > { %457 = vst.msk [vmem:[%s297_s11] sm:$0xf] %vm456_vm4, %v455_v43 }
 0x33c PF: > { %s13_s16 = sadd.s32 1, %s693_s16   ;;  %s809_s12 = smov %s685_s14 }
 0x33d   : > { %p10_p8 = scmp.ge.s32.totalorder %s13_s16, 10   ;;  %s810_s13 = smov %s689_s15 }
 0x33e   : > { %s811_s14 = smov %s814_s17  ;;  %s812_s15 = smov %s818_s18 }
 0x33f   :  { %12 = sbr.rel (!%p10_p8) target bundleno = 3 (0x3), region = 76 }

// kernel: _lambda_.24
= control target key start
LH: loop header
LB: loop body
LE: loop exit
PB: predicated region body
PF: predicated region fallthrough
CT: control target
= control target key end

     0   :  { %vm31_vm0 = vcmask 261120   ;;  %v337_v0 = vmov 0.0   ;;  %vm338_vm1 = vmmov 0   ;;  %vm146_vm2 = vcmask 523264   ;;  %s430_s1 = inlined_call_operand.vmem [shape: bf16[32,64], index: 1, kind: input, shape index: {}]   ;;  %s431_s3 = inlined_call_operand.vmem [shape: bf16[64,32], index: 3, kind: input, shape index: {}]   ;;  %s432_s0 = inlined_call_operand.vmem [shape: bf16[16,32], index: 0, kind: input, shape index: {}]   ;;  %s433_s2 = inlined_call_operand.vmem [shape: f32[1,64], index: 2, kind: input, shape index: {}]   ;;  %s434_s4 = inlined_call_operand.vmem [shape: f32[1,32], index: 4, kind: input, shape index: {}]   ;;  %s435_s5 = inlined_call_operand.vmem [shape: f32[1,32], index: 5, kind: input, shape index: {}]   ;;  %s436_s6 = inlined_call_operand.vmem [shape: f32[1,32], index: 6, kind: input, shape index: {}]   ;;  %s437_s7 = inlined_call_operand.vmem [shape: bf16[16,32], index: 7, kind: output, shape index: {}]  }
   0x1   :  { %304 = vmatprep.subr.bf16.mxu0 %v337_v0  ;;  %v326_v1 = vld [vmem:[%s430_s1] sm:$0xff]   ;;  %308 = vmatprep.mubr.msk.bf16.mxu0 %vm338_vm1, %v337_v0  ;;  %32 = vst.msk [vmem:[#allocation2] sm:$0xff] %vm31_vm0, %v337_v0  ;;  %33 = vst.msk [vmem:[#allocation2 + $0x8] sm:$0xff] %vm31_vm0, %v337_v0  ;;  %v327_v2 = vld [vmem:[%s430_s1 + $0x8] sm:$0xff]   ;;  %vm268_vm3 = vcmask 257024  }
   0x2   :  { %312 = vmatprep.subr.bf16.mxu1 %v337_v0  ;;  %320 = vmatprep.mubr.msk.bf16.mxu1 %vm338_vm1, %v337_v0  ;;  %v329_v3 = vld [vmem:[%s431_s3] sm:$0xff]   ;;  %v330_v5 = vld [vmem:[%s431_s3 + $0x8] sm:$0xff]   ;;  %v331_v6 = vld [vmem:[%s431_s3 + $0x10] sm:$0xff]  }
   0x3   :  { %305 = vmatpush3.bf16.msra.mxu0 %v326_v1  ;;  %v328_v4 = vld [vmem:[%s432_s0] sm:$0xff]   ;;  %313 = vmatpush3.bf16.msra.mxu1 %v329_v3  ;;  %v332_v7 = vld [vmem:[%s431_s3 + $0x18] sm:$0xff]  }
   0x4   :  { %306 = vmatprep.subr.bf16.mxu0 %v337_v0  ;;  %314 = vmatprep.subr.bf16.mxu1 %v337_v0  ;;  %v275_v8 = vld [vmem:[%s433_s2] ss:$0 sm:$0xff] }
   0x5   :  { %v293_v26 = vld [vmem:[%s432_s0] sm:$0xff]  }
   0x6   :  { %v285_v27 = vld [vmem:[%s434_s4] ss:$0 sm:$0xff]  ;;  %v294_v28 = vunpack.c.l.bf16 %v293_v26  ;;  %v295_v31 = vunpack.c.h.bf16 %v293_v26 }
   0x7   :  { %307 = vmatpush3.bf16.msra.mxu0 %v327_v2  ;;  %315 = vmatpush3.bf16.msra.mxu1 %v330_v5  ;;  %v286_v55 = vld [vmem:[%s435_s5] ss:$0 sm:$0xff] }
   0x8   :  { %316 = vmatprep.subr.bf16.mxu1 %v337_v0  ;;  %v112_v18 = vld [vmem:[#allocation2] sm:$0xff]  ;;  %v113_v20 = vld [vmem:[#allocation2 + $0x8] sm:$0xff] }
   0x9   :  { %v287_v57 = vld [vmem:[%s436_s6] ss:$0 sm:$0xff] }
   0xa   :  { %309 = vmatmul.mubr.msk.bf16.vlgmr.msra.gmra.mrb[0].mxu0 %vm31_vm0, %v328_v4 }
   0xb   :  { %317 = vmatpush3.bf16.msra.mxu1 %v331_v6 }
   0xc   :  { %318 = vmatprep.subr.bf16.mxu1 %v337_v0 }
   0xf   :  { %319 = vmatpush3.bf16.msra.mxu1 %v332_v7 }
  0xdd   :  { %v102_v9 = vpop.f32.mrb[0].mxu0 }
  0xde   :  { %v103_v10 = vadd.f32 %v275_v8, %v102_v9  ;;  %v310_v11 = vpop.f32.mrb[1].mxu0 }
  0xdf   :  { %v105_v12 = vpop.f32.mrb[2].mxu0 }
  0xe0   :  { %v106_v13 = vadd.f32 %v275_v8, %v105_v12  ;;  %v311_v14 = vpop.f32.mrb[3].mxu0  ;;  %v109_v15 = vmax.f32 %v103_v10, 0.0 }
  0xe2   :  { %v110_v16 = vmax.f32 %v106_v13, 0.0 }
  0xe4   :  { %v111_v17 = vpack.c.bf16 %v110_v16, %v109_v15 }
  0xe6   :  { %321 = vmatmul.mubr.msk.bf16.vlgmr.msra.gmra.mrb[0].mxu1 %vm146_vm2, %v111_v17 }
 0x1b9   :  { %v184_v19 = vpop.f32.mrb[0].mxu1 }
 0x1ba   :  { %v191_v21 = vadd.f32 %v184_v19, %v112_v18  ;;  %v322_v22 = vpop.f32.mrb[1].mxu1 }
 0x1bb   :  { %v187_v23 = vpop.f32.mrb[2].mxu1 }
 0x1bc   :  { %193 = vst.msk [vmem:[#allocation2] sm:$0xff] %vm31_vm0, %v191_v21  ;;  %v192_v24 = vadd.f32 %v187_v23, %v113_v20  ;;  %v323_v25 = vpop.f32.mrb[3].mxu1 }
 0x1be   :  { %194 = vst.msk [vmem:[#allocation2 + $0x8] sm:$0xff] %vm31_vm0, %v192_v24 }
 0x1c3   :  { %v198_v29 = vld [vmem:[#allocation2] sm:$0xff] }
 0x1c4   :  { %v207_v30 = vadd.f32 %v285_v27, %v198_v29 }
 0x1c5   :  { %v199_v32 = vld [vmem:[#allocation2 + $0x8] sm:$0xff] }
 0x1c6   :  { %v213_v33 = vadd.f32 %v294_v28, %v207_v30  ;;  %v208_v34 = vadd.f32 %v285_v27, %v199_v32 }
 0x1c8   :  { %v215_v35 = vsel %vm31_vm0, %v213_v33, 0.0  ;;  %v214_v36 = vadd.f32 %v295_v31, %v208_v34 }
 0x1c9   :  { %216 = vadd.xlane.f32.xlu0 %v215_v35 }
 0x1ca   :  { %v218_v37 = vsel %vm31_vm0, %v214_v36, 0.0 }
 0x1cd   :  { %219 = vadd.xlane.f32.xlu0 %v218_v37 }
 0x256   :  { %v217_v38 = vpop.xlane.xlu0 %216 }
 0x257   :  { %v222_v39 = vmul.f32 0.03125, %v217_v38 }
 0x259   :  { %v224_v40 = vsub.f32 %v213_v33, %v222_v39 }
 0x25a   :  { %v220_v41 = vpop.xlane.xlu0 %219 }
 0x25b   :  { %v223_v42 = vmul.f32 0.03125, %v220_v41  ;;  %v226_v43 = vmul.f32 %v224_v40, %v224_v40 }
 0x25d   :  { %v225_v44 = vsub.f32 %v214_v36, %v223_v42  ;;  %v228_v45 = vsel %vm31_vm0, %v226_v43, 0.0 }
 0x25e   :  { %229 = vadd.xlane.f32.xlu1 %v228_v45 }
 0x25f   :  { %v227_v46 = vmul.f32 %v225_v44, %v225_v44 }
 0x261   :  { %v231_v47 = vsel %vm31_vm0, %v227_v46, 0.0 }
 0x262   :  { %232 = vadd.xlane.f32.xlu1 %v231_v47 }
 0x2eb   :  { %v230_v48 = vpop.xlane.xlu1 %229 }
 0x2ec   :  { %v234_v49 = vmul.f32 0.03125, %v230_v48 }
 0x2ee   :  { %v236_v50 = vadd.f32 1e-05, %v234_v49 }
 0x2ef   :  { %v233_v51 = vpop.xlane.xlu1 %232 }
 0x2f0   :  { %333 = vrsqrt.f32 %v236_v50  ;;  %v235_v52 = vmul.f32 0.03125, %v233_v51 }
 0x2f2   :  { %v237_v53 = vadd.f32 1e-05, %v235_v52 }
 0x2f4   :  { %335 = vrsqrt.f32 %v237_v53 }
 0x2fa   :  { %v334_v54 = vpop.eup %333 }
 0x2fb   :  { %v240_v56 = vmul.f32 %v334_v54, %v224_v40 }
 0x2fd   :  { %v249_v58 = vmul.f32 %v286_v55, %v240_v56 }
 0x2fe   :  { %v336_v59 = vpop.eup %335 }
 0x2ff   :  { %v258_v60 = vadd.f32 %v287_v57, %v249_v58  ;;  %v241_v61 = vmul.f32 %v336_v59, %v225_v44 }
 0x301   :  { %v290_v62 = vpack.c.bf16 %v258_v60, %v258_v60  ;;  %v250_v63 = vmul.f32 %v286_v55, %v241_v61 }
 0x303   :  { %269 = vst.msk [vmem:[%s437_s7] sm:$0xf] %vm268_vm3, %v290_v62  ;;  %v259_v0 = vadd.f32 %v287_v57, %v250_v63 }
 0x305   :  { %v291_v1 = vpack.c.bf16 %v259_v0, %v259_v0 }
 0x307   :  { %270 = vst.msk [vmem:[%s437_s7 + $0x4] sm:$0xf] %vm268_vm3, %v291_v1 }

// kernel: _lambda_.33
= control target key start
LH: loop header
LB: loop body
LE: loop exit
PB: predicated region body
PF: predicated region fallthrough
CT: control target
= control target key end

     0   :  { %vm19_vm0 = vcmask 261120   ;;  %s170_s0 = inlined_call_operand.vmem [shape: bf16[16,32], index: 0, kind: input, shape index: {}]   ;;  %s171_s1 = inlined_call_operand.vmem [shape: f32[1,32], index: 1, kind: input, shape index: {}]   ;;  %s172_s2 = inlined_call_operand.vmem [shape: f32[1,32], index: 2, kind: input, shape index: {}]   ;;  %s173_s3 = inlined_call_operand.hbm [shape: f32[16,32], index: 3, kind: output, shape index: {}]  }
   0x1   :  { %v86_v0 = vld [vmem:[%s170_s0] sm:$0xff]  }
   0x2   :  { %8 = vsyncpa [#allocation3], 0  ;;  %v87_v1 = vunpack.c.l.bf16 %v86_v0  ;;  %v88_v2 = vunpack.c.h.bf16 %v86_v0  ;;  %v83_v22 = vld [vmem:[%s171_s1] ss:$0 sm:$0xff]  ;;  %s120_s17 = smov [#allocation2]  }
   0x3   :  { %v84_v24 = vld [vmem:[%s172_s2] ss:$0 sm:$0xff]  ;;  %s72_s18 = sshll.u32 %s120_s17, 4  ;;  %s73_s18 = int_to_ptr.vmem [resolvable:$true] %s72_s18 }
   0x4   :  { %v20_v3 = vsel %vm19_vm0, %v87_v1, 0.0  ;;  %v23_v4 = vsel %vm19_vm0, %v88_v2, 0.0  ;;  %s96_s19 = scalar_lea.vmem %s73_s18, 256  ;;  %p101_p1 = scmp.lt.s32.totalorder %s73_s18, %s73_s18 }
   0x5   :  { %21 = vadd.xlane.f32.xlu0 %v20_v3  ;;  %p97_p0 = scmp.ne.s32.totalorder %s73_s18, %s96_s19  ;;  %p102_p2 = scmp.lt.s32.totalorder %s96_s19, %s96_s19 }
   0x7   :  { %p103_p3 = por %p102_p2, %p101_p1 }
   0x9   :  { %24 = vadd.xlane.f32.xlu0 %v23_v4  ;;  %p104_p4 = pnand %p103_p3, %p97_p0 }
  0x92   :  { %v22_v5 = vpop.xlane.xlu0 %21 }
  0x93   :  { %v27_v6 = vmul.f32 0.03125, %v22_v5 }
  0x95   :  { %v29_v7 = vsub.f32 %v87_v1, %v27_v6 }
  0x96   :  { %v25_v8 = vpop.xlane.xlu0 %24 }
  0x97   :  { %v28_v9 = vmul.f32 0.03125, %v25_v8  ;;  %v31_v10 = vmul.f32 %v29_v7, %v29_v7 }
  0x99   :  { %v30_v11 = vsub.f32 %v88_v2, %v28_v9  ;;  %v33_v12 = vsel %vm19_vm0, %v31_v10, 0.0 }
  0x9a   :  { %34 = vadd.xlane.f32.xlu1 %v33_v12 }
  0x9b   :  { %v32_v13 = vmul.f32 %v30_v11, %v30_v11 }
  0x9d   :  { %v36_v14 = vsel %vm19_vm0, %v32_v13, 0.0 }
  0x9e   :  { %37 = vadd.xlane.f32.xlu1 %v36_v14 }
 0x127   :  { %v35_v15 = vpop.xlane.xlu1 %34 }
 0x128   :  { %v39_v16 = vmul.f32 0.03125, %v35_v15 }
 0x12a   :  { %v41_v17 = vadd.f32 1e-05, %v39_v16 }
 0x12b   :  { %v38_v18 = vpop.xlane.xlu1 %37 }
 0x12c   :  { %92 = vrsqrt.f32 %v41_v17  ;;  %v40_v19 = vmul.f32 0.03125, %v38_v18 }
 0x12e   :  { %v42_v20 = vadd.f32 1e-05, %v40_v19 }
 0x130   :  { %94 = vrsqrt.f32 %v42_v20 }
 0x136   :  { %v93_v21 = vpop.eup %92 }
 0x137   :  { %v45_v23 = vmul.f32 %v93_v21, %v29_v7 }
 0x139   :  { %v54_v25 = vmul.f32 %v83_v22, %v45_v23 }
 0x13a   :  { %v95_v26 = vpop.eup %94 }
 0x13b   :  { %v46_v27 = vmul.f32 %v95_v26, %v30_v11  ;;  %v63_v28 = vadd.f32 %v84_v24, %v54_v25 }
 0x13d   :  { %v55_v29 = vmul.f32 %v83_v22, %v46_v27  ;;  %65 = vst.msk [vmem:[#allocation2] sm:$0xff] %vm19_vm0, %v63_v28 }
 0x13f   :  { %v64_v30 = vadd.f32 %v84_v24, %v55_v29 }
 0x141   :  { %66 = vst.msk [vmem:[#allocation2 + $0x8] sm:$0xff] %vm19_vm0, %v64_v30 }
 0x142   :  { %107 = shalt.err (!%p104_p4)
}
 0x143   :  { %s108_s20 = scalar_lea.hbm %s173_s3, 256 }
 0x144   :  { %p109_p5 = scmp.ne.s32.totalorder %s173_s3, %s108_s20  ;;  %p112_p6 = scmp.lt.u32.totalorder %s108_s20, %s173_s3 }
 0x146   :  { %p114_p7 = pnand %p112_p6, %p109_p5 }
 0x148   :  { %117 = shalt.err (!%p114_p7)
}
 0x149   :  { %s121_s25 = smov 128   ;;  %s122_s26 = smov 8  }
 0x14a   :  { %78 = dma.vmem_to_hbm [thread:$0]  %s73_s18, 256, %s173_s3, [#allocation3], %s121_s25, %s121_s25, %s122_s26  }
 0x14b   :  { %118 = dma.done.wait [#allocation3], 256  }
 0x14c   :  { %119 = vsyncadd [#allocation3], 4294967040 }
 0x14d   :  { %82 = vsyncpa [#allocation3], 1 }

</bundles_post_ra>
